<compile_context>
chip_gen: v7x
topology: tpu7x:2x2x1
jax: 0.10.0
libtpu: 0.0.40
codegen_flags: <defaults>
</compile_context>

<pallas_src>
import functools

import numpy as np
import jax
import jax.numpy as jnp
from jax.experimental import pallas as pl
from jax.experimental.pallas import tpu as pltpu

_HALO = 128  # lanes of look-ahead borrowed from the next tile; must be >= num_taps - 1


def _butterfly_kernel(tap_a_ref, tap_b_ref, cur_ref, halo_ref, out_ref, *, num_taps, chunk):
    """Sublane-packed complex 2x2 butterfly 'valid' convolution for one time tile.

    tap_a_ref: VMEM (8, T) f32  per-sublane taps for the REAL accumulator
               rows = [hr0, -hi0, hr1, -hi1, hr3, -hi3, hr2, -hi2]
    tap_b_ref: VMEM (8, T) f32  per-sublane taps for the IMAG accumulator
               rows = [hi0,  hr0, hi1,  hr1, hi3,  hr3, hi2,  hr2]
    cur_ref:   VMEM (4, W) f32  packed signal, current tile, rows [yr0, yi0, yr1, yi1]
    halo_ref:  VMEM (4, _HALO) f32  first 128 lanes of the next tile (look-ahead)
    out_ref:   VMEM (4, W) f32  rows = [x_re, y_re, x_im, y_im]
    """
    T = num_taps
    C = chunk
    W = cur_ref.shape[-1]
    n_chunks = W // C

    tap_a = tap_a_ref[...]                        # (8, T), register resident
    tap_b = tap_b_ref[...]                        # (8, T)
    ta = [tap_a[:, j:j + 1] for j in range(T)]    # hoisted per-tap lane splats
    tb = [tap_b[:, j:j + 1] for j in range(T)]

    def do_chunk(base, win4):
        # win4: (4, C + _HALO) rows [yr0, yi0, yr1, yi1].  Duplicate in-register to the
        # 8-row full-vreg-density plane [yr0,yi0,yr1,yi1, yr0,yi0,yr1,yi1]; the taps
        # are packed in filter order (0, 1, 3, 2) to match this duplication.
        win8 = jnp.concatenate([win4, win4], axis=0)       # (8, C + _HALO)
        acc_a = jnp.zeros((8, C), jnp.float32)             # real-part product streams
        acc_b = jnp.zeros((8, C), jnp.float32)             # imag-part product streams
        for j in range(T):
            s = T - 1 - j                                  # flipped kernel -> true 'valid' conv
            plane = win8[:, s:s + C]                       # lane-shifted slice (register resident)
            acc_a = acc_a + ta[j] * plane
            acc_b = acc_b + tb[j] * plane
        # Cross-sublane combine (XLU): filters (0,1) -> output x, filters (3,2) -> output y.
        x_re = jnp.sum(acc_a[0:4], axis=0, keepdims=True)
        y_re = jnp.sum(acc_a[4:8], axis=0, keepdims=True)
        x_im = jnp.sum(acc_b[0:4], axis=0, keepdims=True)
        y_im = jnp.sum(acc_b[4:8], axis=0, keepdims=True)
        # One 4-sublane store per chunk instead of four single-sublane masked stores.
        out_ref[:, base:base + C] = jnp.concatenate([x_re, y_re, x_im, y_im], axis=0)

    # Every chunk except the last finds its (C + HALO)-wide window inside the current
    # tile (valid because C >= _HALO); the last chunk borrows the 128-lane halo block.
    for c in range(n_chunks - 1):
        base = c * C
        do_chunk(base, cur_ref[:, base:base + C + _HALO])
    base = (n_chunks - 1) * C
    do_chunk(base, jnp.concatenate([cur_ref[:, base:base + C], halo_ref[...]], axis=-1))


def butterfly2x2_forward(y, taps, *, tile=2048, chunk=256):
    """y: complex64 (N, 2); taps: complex64 (4, T). Returns complex64 (L, 2), L = N - T + 1."""
    N = y.shape[0]
    T = taps.shape[1]
    assert y.shape[1] == 2
    assert taps.shape[0] == 4
    assert T - 1 <= _HALO, "filter longer than halo window; raise _HALO"
    assert tile % 128 == 0 and chunk % 128 == 0
    L = N - T + 1
    assert L >= 1

    # Lane-dense tile: multiple of 128, wide enough to amortize per-grid-step overhead,
    # but clamped so the 'parallel' grid keeps >= 2 steps when L allows (v7x megacore).
    W = max(128, min(tile, pl.cdiv(pl.cdiv(L, 2), 128) * 128))
    C = chunk if (W % chunk == 0) else 128
    num_tiles = pl.cdiv(L, W)
    L_pad = num_tiles * W

    yr = jnp.real(y).astype(jnp.float32)      # (N, 2)
    yi = jnp.imag(y).astype(jnp.float32)      # (N, 2)
    hr = jnp.real(taps).astype(jnp.float32)   # (4, T)
    hi = jnp.imag(taps).astype(jnp.float32)   # (4, T)

    # 4-row packed signal [yr0, yi0, yr1, yi1]; duplication to 8 rows happens
    # in-register inside the kernel.  Pad so every tile plus its 128-lane halo exists.
    ypack = jnp.stack([yr, yi], axis=-1).reshape(N, 4).T          # (4, N)
    ypack = jnp.pad(ypack, ((0, 0), (0, L_pad + _HALO - N)))      # (4, L_pad + _HALO)

    # Per-sublane tap vectors; filters packed in order (0, 1, 3, 2) to match the
    # in-kernel duplicated plane.  The -hi sign of the complex multiply's real part
    # is folded into tap_a.
    perm = jnp.array([0, 1, 3, 2])
    hrp, hip = hr[perm, :], hi[perm, :]
    tap_a = jnp.stack([hrp, -hip], axis=1).reshape(8, T)   # [hr0,-hi0,hr1,-hi1,hr3,-hi3,hr2,-hi2]
    tap_b = jnp.stack([hip, hrp], axis=1).reshape(8, T)    # [hi0, hr0,hi1, hr1,hi3, hr3,hi2, hr2]

    kernel = functools.partial(_butterfly_kernel, num_taps=T, chunk=C)

    out = pl.pallas_call(
        kernel,
        out_shape=jax.ShapeDtypeStruct((4, L_pad), jnp.float32),
        grid_spec=pltpu.PrefetchScalarGridSpec(
            num_scalar_prefetch=0,
            grid=(num_tiles,),
            in_specs=[
                pl.BlockSpec((8, T), lambda i: (0, 0)),        # tap_a (resident)
                pl.BlockSpec((8, T), lambda i: (0, 0)),        # tap_b (resident)
                pl.BlockSpec((4, W), lambda i: (0, i)),        # packed signal, current tile
                pl.BlockSpec((4, _HALO),                       # 128-lane look-ahead only
                             lambda i: (0, (i + 1) * (W // _HALO))),
            ],
            out_specs=pl.BlockSpec((4, W), lambda i: (0, i)),
        ),
        compiler_params=pltpu.CompilerParams(
            dimension_semantics=("parallel",)),  # megacore split on v7x
    )(tap_a, tap_b, ypack, ypack)

    # Fused epilogue: drop lane padding, recombine to complex64, transpose -> (L, 2).
    return jax.lax.complex(out[0:2, :L], out[2:4, :L]).T


def make_taps(num_taps, key):
    """Deterministic Butterfly2x2 init: center tap = 1 on every filter, plus a small
    deterministic complex perturbation so the butterfly mixing is exercised."""
    k1, k2 = jax.random.split(key)
    taps = jnp.zeros((4, num_taps), dtype=jnp.complex64)
    taps = taps.at[:, num_taps // 2].set(1.0 + 0.0j)
    noise = (0.05 * jax.random.normal(k1, (4, num_taps), dtype=jnp.float32)
             + 1j * 0.05 * jax.random.normal(k2, (4, num_taps), dtype=jnp.float32))
    return (taps + noise.astype(jnp.complex64)).astype(jnp.complex64)


if __name__ == "__main__":
    key = jax.random.PRNGKey(0)
    k_taps, k_yr, k_yi = jax.random.split(key, 3)

    N = 1024          # sequence length (time samples)
    num_taps = 9      # filter length
    L = N - num_taps + 1

    taps = make_taps(num_taps, k_taps)                                   # (4, T) complex64
    y = (jax.random.normal(k_yr, (N, 2), dtype=jnp.float32)
         + 1j * jax.random.normal(k_yi, (N, 2), dtype=jnp.float32)).astype(jnp.complex64)

    out = butterfly2x2_forward(y, taps)
    out = jax.block_until_ready(out)

    # Reference (numpy, true 'valid' convolution — same semantics as
    # mokka.convolve_overlap_save / np.convolve).
    y_np = np.asarray(y).astype(np.complex128)
    h_np = np.asarray(taps).astype(np.complex128)
    ref_x = (np.convolve(y_np[:, 0], h_np[0], mode="valid")
             + np.convolve(y_np[:, 1], h_np[1], mode="valid"))
    ref_y = (np.convolve(y_np[:, 1], h_np[2], mode="valid")
             + np.convolve(y_np[:, 0], h_np[3], mode="valid"))
    ref = np.stack([ref_x, ref_y], axis=1)

    assert out.shape == (L, 2) and out.dtype == jnp.complex64
    np.testing.assert_allclose(np.asarray(out), ref, rtol=1e-4, atol=1e-4)
    print("KERNEL_OK")
</pallas_src>

<mosaic_0001>
module attributes {stable_mosaic.version = 11 : i64} {
  func.func @_butterfly_kernel(%arg0: i32, %arg1: memref<8x9xf32, #tpu.memory_space<vmem>>, %arg2: memref<8x9xf32, #tpu.memory_space<vmem>>, %arg3: memref<4x512xf32, #tpu.memory_space<vmem>>, %arg4: memref<4x128xf32, #tpu.memory_space<vmem>>, %arg5: memref<4x512xf32, #tpu.memory_space<vmem>>) attributes {dimension_semantics = [#tpu.dimension_semantics<parallel>], iteration_bounds = array<i64: 2>, scalar_prefetch = 0 : i64, scratch_operands = 0 : i64, tpu.core_type = #tpu.core_type<tc>, window_params = [{pipeline_mode = #tpu.pipeline_mode<synchronous>, transform_indices = @transform_0, window_bounds = array<i64: 8, 9>}, {pipeline_mode = #tpu.pipeline_mode<synchronous>, transform_indices = @transform_1, window_bounds = array<i64: 8, 9>}, {transform_indices = @transform_2, window_bounds = array<i64: 4, 512>}, {transform_indices = @transform_3, window_bounds = array<i64: 4, 128>}, {transform_indices = @transform_4, window_bounds = array<i64: 4, 512>}]} {
    %c0 = arith.constant 0 : index
    %c0_0 = arith.constant 0 : index
    %0 = vector.load %arg1[%c0, %c0_0] : memref<8x9xf32, #tpu.memory_space<vmem>>, vector<8x9xf32>
    %c0_1 = arith.constant 0 : index
    %c0_2 = arith.constant 0 : index
    %1 = vector.load %arg2[%c0_1, %c0_2] : memref<8x9xf32, #tpu.memory_space<vmem>>, vector<8x9xf32>
    %2 = vector.extract_strided_slice %0 {offsets = [0, 0], sizes = [8, 1], strides = [1, 1]} : vector<8x9xf32> to vector<8x1xf32>
    %3 = vector.extract_strided_slice %0 {offsets = [0, 1], sizes = [8, 1], strides = [1, 1]} : vector<8x9xf32> to vector<8x1xf32>
    %4 = vector.extract_strided_slice %0 {offsets = [0, 2], sizes = [8, 1], strides = [1, 1]} : vector<8x9xf32> to vector<8x1xf32>
    %5 = vector.extract_strided_slice %0 {offsets = [0, 3], sizes = [8, 1], strides = [1, 1]} : vector<8x9xf32> to vector<8x1xf32>
    %6 = vector.extract_strided_slice %0 {offsets = [0, 4], sizes = [8, 1], strides = [1, 1]} : vector<8x9xf32> to vector<8x1xf32>
    %7 = vector.extract_strided_slice %0 {offsets = [0, 5], sizes = [8, 1], strides = [1, 1]} : vector<8x9xf32> to vector<8x1xf32>
    %8 = vector.extract_strided_slice %0 {offsets = [0, 6], sizes = [8, 1], strides = [1, 1]} : vector<8x9xf32> to vector<8x1xf32>
    %9 = vector.extract_strided_slice %0 {offsets = [0, 7], sizes = [8, 1], strides = [1, 1]} : vector<8x9xf32> to vector<8x1xf32>
    %10 = vector.extract_strided_slice %0 {offsets = [0, 8], sizes = [8, 1], strides = [1, 1]} : vector<8x9xf32> to vector<8x1xf32>
    %11 = vector.extract_strided_slice %1 {offsets = [0, 0], sizes = [8, 1], strides = [1, 1]} : vector<8x9xf32> to vector<8x1xf32>
    %12 = vector.extract_strided_slice %1 {offsets = [0, 1], sizes = [8, 1], strides = [1, 1]} : vector<8x9xf32> to vector<8x1xf32>
    %13 = vector.extract_strided_slice %1 {offsets = [0, 2], sizes = [8, 1], strides = [1, 1]} : vector<8x9xf32> to vector<8x1xf32>
    %14 = vector.extract_strided_slice %1 {offsets = [0, 3], sizes = [8, 1], strides = [1, 1]} : vector<8x9xf32> to vector<8x1xf32>
    %15 = vector.extract_strided_slice %1 {offsets = [0, 4], sizes = [8, 1], strides = [1, 1]} : vector<8x9xf32> to vector<8x1xf32>
    %16 = vector.extract_strided_slice %1 {offsets = [0, 5], sizes = [8, 1], strides = [1, 1]} : vector<8x9xf32> to vector<8x1xf32>
    %17 = vector.extract_strided_slice %1 {offsets = [0, 6], sizes = [8, 1], strides = [1, 1]} : vector<8x9xf32> to vector<8x1xf32>
    %18 = vector.extract_strided_slice %1 {offsets = [0, 7], sizes = [8, 1], strides = [1, 1]} : vector<8x9xf32> to vector<8x1xf32>
    %19 = vector.extract_strided_slice %1 {offsets = [0, 8], sizes = [8, 1], strides = [1, 1]} : vector<8x9xf32> to vector<8x1xf32>
    %c0_3 = arith.constant 0 : index
    %c0_4 = arith.constant 0 : index
    %20 = vector.load %arg3[%c0_3, %c0_4] : memref<4x512xf32, #tpu.memory_space<vmem>>, vector<4x384xf32>
    %21 = tpu.concatenate %20, %20 in 0 : vector<4x384xf32>, vector<4x384xf32> -> vector<8x384xf32>
    %cst = arith.constant 0.000000e+00 : f32
    %22 = vector.broadcast %cst : f32 to vector<8x256xf32>
    %cst_5 = arith.constant 0.000000e+00 : f32
    %23 = vector.broadcast %cst_5 : f32 to vector<8x256xf32>
    %24 = vector.extract_strided_slice %21 {offsets = [0, 8], sizes = [8, 256], strides = [1, 1]} : vector<8x384xf32> to vector<8x256xf32>
    %25 = vector.broadcast %2 : vector<8x1xf32> to vector<8x256xf32>
    %26 = arith.mulf %25, %24 : vector<8x256xf32>
    %27 = arith.addf %22, %26 : vector<8x256xf32>
    %28 = vector.broadcast %11 : vector<8x1xf32> to vector<8x256xf32>
    %29 = arith.mulf %28, %24 : vector<8x256xf32>
    %30 = arith.addf %23, %29 : vector<8x256xf32>
    %31 = vector.extract_strided_slice %21 {offsets = [0, 7], sizes = [8, 256], strides = [1, 1]} : vector<8x384xf32> to vector<8x256xf32>
    %32 = vector.broadcast %3 : vector<8x1xf32> to vector<8x256xf32>
    %33 = arith.mulf %32, %31 : vector<8x256xf32>
    %34 = arith.addf %27, %33 : vector<8x256xf32>
    %35 = vector.broadcast %12 : vector<8x1xf32> to vector<8x256xf32>
    %36 = arith.mulf %35, %31 : vector<8x256xf32>
    %37 = arith.addf %30, %36 : vector<8x256xf32>
    %38 = vector.extract_strided_slice %21 {offsets = [0, 6], sizes = [8, 256], strides = [1, 1]} : vector<8x384xf32> to vector<8x256xf32>
    %39 = vector.broadcast %4 : vector<8x1xf32> to vector<8x256xf32>
    %40 = arith.mulf %39, %38 : vector<8x256xf32>
    %41 = arith.addf %34, %40 : vector<8x256xf32>
    %42 = vector.broadcast %13 : vector<8x1xf32> to vector<8x256xf32>
    %43 = arith.mulf %42, %38 : vector<8x256xf32>
    %44 = arith.addf %37, %43 : vector<8x256xf32>
    %45 = vector.extract_strided_slice %21 {offsets = [0, 5], sizes = [8, 256], strides = [1, 1]} : vector<8x384xf32> to vector<8x256xf32>
    %46 = vector.broadcast %5 : vector<8x1xf32> to vector<8x256xf32>
    %47 = arith.mulf %46, %45 : vector<8x256xf32>
    %48 = arith.addf %41, %47 : vector<8x256xf32>
    %49 = vector.broadcast %14 : vector<8x1xf32> to vector<8x256xf32>
    %50 = arith.mulf %49, %45 : vector<8x256xf32>
    %51 = arith.addf %44, %50 : vector<8x256xf32>
    %52 = vector.extract_strided_slice %21 {offsets = [0, 4], sizes = [8, 256], strides = [1, 1]} : vector<8x384xf32> to vector<8x256xf32>
    %53 = vector.broadcast %6 : vector<8x1xf32> to vector<8x256xf32>
    %54 = arith.mulf %53, %52 : vector<8x256xf32>
    %55 = arith.addf %48, %54 : vector<8x256xf32>
    %56 = vector.broadcast %15 : vector<8x1xf32> to vector<8x256xf32>
    %57 = arith.mulf %56, %52 : vector<8x256xf32>
    %58 = arith.addf %51, %57 : vector<8x256xf32>
    %59 = vector.extract_strided_slice %21 {offsets = [0, 3], sizes = [8, 256], strides = [1, 1]} : vector<8x384xf32> to vector<8x256xf32>
    %60 = vector.broadcast %7 : vector<8x1xf32> to vector<8x256xf32>
    %61 = arith.mulf %60, %59 : vector<8x256xf32>
    %62 = arith.addf %55, %61 : vector<8x256xf32>
    %63 = vector.broadcast %16 : vector<8x1xf32> to vector<8x256xf32>
    %64 = arith.mulf %63, %59 : vector<8x256xf32>
    %65 = arith.addf %58, %64 : vector<8x256xf32>
    %66 = vector.extract_strided_slice %21 {offsets = [0, 2], sizes = [8, 256], strides = [1, 1]} : vector<8x384xf32> to vector<8x256xf32>
    %67 = vector.broadcast %8 : vector<8x1xf32> to vector<8x256xf32>
    %68 = arith.mulf %67, %66 : vector<8x256xf32>
    %69 = arith.addf %62, %68 : vector<8x256xf32>
    %70 = vector.broadcast %17 : vector<8x1xf32> to vector<8x256xf32>
    %71 = arith.mulf %70, %66 : vector<8x256xf32>
    %72 = arith.addf %65, %71 : vector<8x256xf32>
    %73 = vector.extract_strided_slice %21 {offsets = [0, 1], sizes = [8, 256], strides = [1, 1]} : vector<8x384xf32> to vector<8x256xf32>
    %74 = vector.broadcast %9 : vector<8x1xf32> to vector<8x256xf32>
    %75 = arith.mulf %74, %73 : vector<8x256xf32>
    %76 = arith.addf %69, %75 : vector<8x256xf32>
    %77 = vector.broadcast %18 : vector<8x1xf32> to vector<8x256xf32>
    %78 = arith.mulf %77, %73 : vector<8x256xf32>
    %79 = arith.addf %72, %78 : vector<8x256xf32>
    %80 = vector.extract_strided_slice %21 {offsets = [0, 0], sizes = [8, 256], strides = [1, 1]} : vector<8x384xf32> to vector<8x256xf32>
    %81 = vector.broadcast %10 : vector<8x1xf32> to vector<8x256xf32>
    %82 = arith.mulf %81, %80 : vector<8x256xf32>
    %83 = arith.addf %76, %82 : vector<8x256xf32>
    %84 = vector.broadcast %19 : vector<8x1xf32> to vector<8x256xf32>
    %85 = arith.mulf %84, %80 : vector<8x256xf32>
    %86 = arith.addf %79, %85 : vector<8x256xf32>
    %87 = vector.extract_strided_slice %83 {offsets = [0, 0], sizes = [4, 256], strides = [1, 1]} : vector<8x256xf32> to vector<4x256xf32>
    %cst_6 = arith.constant dense<0.000000e+00> : vector<256xf32>
    %88 = vector.multi_reduction <add>, %87, %cst_6 [0] : vector<4x256xf32> to vector<256xf32>
    %89 = vector.shape_cast %88 : vector<256xf32> to vector<1x256xf32>
    %90 = vector.extract_strided_slice %83 {offsets = [4, 0], sizes = [4, 256], strides = [1, 1]} : vector<8x256xf32> to vector<4x256xf32>
    %cst_7 = arith.constant dense<0.000000e+00> : vector<256xf32>
    %91 = vector.multi_reduction <add>, %90, %cst_7 [0] : vector<4x256xf32> to vector<256xf32>
    %92 = vector.shape_cast %91 : vector<256xf32> to vector<1x256xf32>
    %93 = vector.extract_strided_slice %86 {offsets = [0, 0], sizes = [4, 256], strides = [1, 1]} : vector<8x256xf32> to vector<4x256xf32>
    %cst_8 = arith.constant dense<0.000000e+00> : vector<256xf32>
    %94 = vector.multi_reduction <add>, %93, %cst_8 [0] : vector<4x256xf32> to vector<256xf32>
    %95 = vector.shape_cast %94 : vector<256xf32> to vector<1x256xf32>
    %96 = vector.extract_strided_slice %86 {offsets = [4, 0], sizes = [4, 256], strides = [1, 1]} : vector<8x256xf32> to vector<4x256xf32>
    %cst_9 = arith.constant dense<0.000000e+00> : vector<256xf32>
    %97 = vector.multi_reduction <add>, %96, %cst_9 [0] : vector<4x256xf32> to vector<256xf32>
    %98 = vector.shape_cast %97 : vector<256xf32> to vector<1x256xf32>
    %99 = tpu.concatenate %89, %92, %95, %98 in 0 : vector<1x256xf32>, vector<1x256xf32>, vector<1x256xf32>, vector<1x256xf32> -> vector<4x256xf32>
    %c0_10 = arith.constant 0 : index
    %c0_11 = arith.constant 0 : index
    %100 = vector.load %arg5[%c0_10, %c0_11] : memref<4x512xf32, #tpu.memory_space<vmem>>, vector<4x256xf32>
    tpu.vector_store %arg5[%c0_10, %c0_11], %99 {strides = array<i32>} : memref<4x512xf32, #tpu.memory_space<vmem>>, vector<4x256xf32>,
    %c0_12 = arith.constant 0 : index
    %c256 = arith.constant 256 : index
    %101 = vector.load %arg3[%c0_12, %c256] : memref<4x512xf32, #tpu.memory_space<vmem>>, vector<4x256xf32>
    %c0_13 = arith.constant 0 : index
    %c0_14 = arith.constant 0 : index
    %102 = vector.load %arg4[%c0_13, %c0_14] : memref<4x128xf32, #tpu.memory_space<vmem>>, vector<4x128xf32>
    %103 = tpu.concatenate %101, %102 in 1 : vector<4x256xf32>, vector<4x128xf32> -> vector<4x384xf32>
    %104 = tpu.concatenate %103, %103 in 0 : vector<4x384xf32>, vector<4x384xf32> -> vector<8x384xf32>
    %cst_15 = arith.constant 0.000000e+00 : f32
    %105 = vector.broadcast %cst_15 : f32 to vector<8x256xf32>
    %cst_16 = arith.constant 0.000000e+00 : f32
    %106 = vector.broadcast %cst_16 : f32 to vector<8x256xf32>
    %107 = vector.extract_strided_slice %104 {offsets = [0, 8], sizes = [8, 256], strides = [1, 1]} : vector<8x384xf32> to vector<8x256xf32>
    %108 = vector.broadcast %2 : vector<8x1xf32> to vector<8x256xf32>
    %109 = arith.mulf %108, %107 : vector<8x256xf32>
    %110 = arith.addf %105, %109 : vector<8x256xf32>
    %111 = vector.broadcast %11 : vector<8x1xf32> to vector<8x256xf32>
    %112 = arith.mulf %111, %107 : vector<8x256xf32>
    %113 = arith.addf %106, %112 : vector<8x256xf32>
    %114 = vector.extract_strided_slice %104 {offsets = [0, 7], sizes = [8, 256], strides = [1, 1]} : vector<8x384xf32> to vector<8x256xf32>
    %115 = vector.broadcast %3 : vector<8x1xf32> to vector<8x256xf32>
    %116 = arith.mulf %115, %114 : vector<8x256xf32>
    %117 = arith.addf %110, %116 : vector<8x256xf32>
    %118 = vector.broadcast %12 : vector<8x1xf32> to vector<8x256xf32>
    %119 = arith.mulf %118, %114 : vector<8x256xf32>
    %120 = arith.addf %113, %119 : vector<8x256xf32>
    %121 = vector.extract_strided_slice %104 {offsets = [0, 6], sizes = [8, 256], strides = [1, 1]} : vector<8x384xf32> to vector<8x256xf32>
    %122 = vector.broadcast %4 : vector<8x1xf32> to vector<8x256xf32>
    %123 = arith.mulf %122, %121 : vector<8x256xf32>
    %124 = arith.addf %117, %123 : vector<8x256xf32>
    %125 = vector.broadcast %13 : vector<8x1xf32> to vector<8x256xf32>
    %126 = arith.mulf %125, %121 : vector<8x256xf32>
    %127 = arith.addf %120, %126 : vector<8x256xf32>
    %128 = vector.extract_strided_slice %104 {offsets = [0, 5], sizes = [8, 256], strides = [1, 1]} : vector<8x384xf32> to vector<8x256xf32>
    %129 = vector.broadcast %5 : vector<8x1xf32> to vector<8x256xf32>
    %130 = arith.mulf %129, %128 : vector<8x256xf32>
    %131 = arith.addf %124, %130 : vector<8x256xf32>
    %132 = vector.broadcast %14 : vector<8x1xf32> to vector<8x256xf32>
    %133 = arith.mulf %132, %128 : vector<8x256xf32>
    %134 = arith.addf %127, %133 : vector<8x256xf32>
    %135 = vector.extract_strided_slice %104 {offsets = [0, 4], sizes = [8, 256], strides = [1, 1]} : vector<8x384xf32> to vector<8x256xf32>
    %136 = vector.broadcast %6 : vector<8x1xf32> to vector<8x256xf32>
    %137 = arith.mulf %136, %135 : vector<8x256xf32>
    %138 = arith.addf %131, %137 : vector<8x256xf32>
    %139 = vector.broadcast %15 : vector<8x1xf32> to vector<8x256xf32>
    %140 = arith.mulf %139, %135 : vector<8x256xf32>
    %141 = arith.addf %134, %140 : vector<8x256xf32>
    %142 = vector.extract_strided_slice %104 {offsets = [0, 3], sizes = [8, 256], strides = [1, 1]} : vector<8x384xf32> to vector<8x256xf32>
    %143 = vector.broadcast %7 : vector<8x1xf32> to vector<8x256xf32>
    %144 = arith.mulf %143, %142 : vector<8x256xf32>
    %145 = arith.addf %138, %144 : vector<8x256xf32>
    %146 = vector.broadcast %16 : vector<8x1xf32> to vector<8x256xf32>
    %147 = arith.mulf %146, %142 : vector<8x256xf32>
    %148 = arith.addf %141, %147 : vector<8x256xf32>
    %149 = vector.extract_strided_slice %104 {offsets = [0, 2], sizes = [8, 256], strides = [1, 1]} : vector<8x384xf32> to vector<8x256xf32>
    %150 = vector.broadcast %8 : vector<8x1xf32> to vector<8x256xf32>
    %151 = arith.mulf %150, %149 : vector<8x256xf32>
    %152 = arith.addf %145, %151 : vector<8x256xf32>
    %153 = vector.broadcast %17 : vector<8x1xf32> to vector<8x256xf32>
    %154 = arith.mulf %153, %149 : vector<8x256xf32>
    %155 = arith.addf %148, %154 : vector<8x256xf32>
    %156 = vector.extract_strided_slice %104 {offsets = [0, 1], sizes = [8, 256], strides = [1, 1]} : vector<8x384xf32> to vector<8x256xf32>
    %157 = vector.broadcast %9 : vector<8x1xf32> to vector<8x256xf32>
    %158 = arith.mulf %157, %156 : vector<8x256xf32>
    %159 = arith.addf %152, %158 : vector<8x256xf32>
    %160 = vector.broadcast %18 : vector<8x1xf32> to vector<8x256xf32>
    %161 = arith.mulf %160, %156 : vector<8x256xf32>
    %162 = arith.addf %155, %161 : vector<8x256xf32>
    %163 = vector.extract_strided_slice %104 {offsets = [0, 0], sizes = [8, 256], strides = [1, 1]} : vector<8x384xf32> to vector<8x256xf32>
    %164 = vector.broadcast %10 : vector<8x1xf32> to vector<8x256xf32>
    %165 = arith.mulf %164, %163 : vector<8x256xf32>
    %166 = arith.addf %159, %165 : vector<8x256xf32>
    %167 = vector.broadcast %19 : vector<8x1xf32> to vector<8x256xf32>
    %168 = arith.mulf %167, %163 : vector<8x256xf32>
    %169 = arith.addf %162, %168 : vector<8x256xf32>
    %170 = vector.extract_strided_slice %166 {offsets = [0, 0], sizes = [4, 256], strides = [1, 1]} : vector<8x256xf32> to vector<4x256xf32>
    %cst_17 = arith.constant dense<0.000000e+00> : vector<256xf32>
    %171 = vector.multi_reduction <add>, %170, %cst_17 [0] : vector<4x256xf32> to vector<256xf32>
    %172 = vector.shape_cast %171 : vector<256xf32> to vector<1x256xf32>
    %173 = vector.extract_strided_slice %166 {offsets = [4, 0], sizes = [4, 256], strides = [1, 1]} : vector<8x256xf32> to vector<4x256xf32>
    %cst_18 = arith.constant dense<0.000000e+00> : vector<256xf32>
    %174 = vector.multi_reduction <add>, %173, %cst_18 [0] : vector<4x256xf32> to vector<256xf32>
    %175 = vector.shape_cast %174 : vector<256xf32> to vector<1x256xf32>
    %176 = vector.extract_strided_slice %169 {offsets = [0, 0], sizes = [4, 256], strides = [1, 1]} : vector<8x256xf32> to vector<4x256xf32>
    %cst_19 = arith.constant dense<0.000000e+00> : vector<256xf32>
    %177 = vector.multi_reduction <add>, %176, %cst_19 [0] : vector<4x256xf32> to vector<256xf32>
    %178 = vector.shape_cast %177 : vector<256xf32> to vector<1x256xf32>
    %179 = vector.extract_strided_slice %169 {offsets = [4, 0], sizes = [4, 256], strides = [1, 1]} : vector<8x256xf32> to vector<4x256xf32>
    %cst_20 = arith.constant dense<0.000000e+00> : vector<256xf32>
    %180 = vector.multi_reduction <add>, %179, %cst_20 [0] : vector<4x256xf32> to vector<256xf32>
    %181 = vector.shape_cast %180 : vector<256xf32> to vector<1x256xf32>
    %182 = tpu.concatenate %172, %175, %178, %181 in 0 : vector<1x256xf32>, vector<1x256xf32>, vector<1x256xf32>, vector<1x256xf32> -> vector<4x256xf32>
    %c0_21 = arith.constant 0 : index
    %c256_22 = arith.constant 256 : index
    %183 = vector.load %arg5[%c0_21, %c256_22] : memref<4x512xf32, #tpu.memory_space<vmem>>, vector<4x256xf32>
    tpu.vector_store %arg5[%c0_21, %c256_22], %182 {strides = array<i32>} : memref<4x512xf32, #tpu.memory_space<vmem>>, vector<4x256xf32>,
    return
  }
  func.func @transform_0(%arg0: i32) -> (i32, i32) {
    %c0_i32 = arith.constant 0 : i32
    %c0_i32_0 = arith.constant 0 : i32
    %c0_i32_1 = arith.constant 0 : i32
    return %c0_i32, %c0_i32_0 : i32, i32
  }
  func.func @transform_1(%arg0: i32) -> (i32, i32) {
    %c0_i32 = arith.constant 0 : i32
    %c0_i32_0 = arith.constant 0 : i32
    %c0_i32_1 = arith.constant 0 : i32
    return %c0_i32, %c0_i32_0 : i32, i32
  }
  func.func @transform_2(%arg0: i32) -> (i32, i32) {
    %c0_i32 = arith.constant 0 : i32
    %c0_i32_0 = arith.constant 0 : i32
    return %c0_i32, %arg0 : i32, i32
  }
  func.func @transform_3(%arg0: i32) -> (i32, i32) {
    %c1_i32 = arith.constant 1 : i32
    %0 = arith.addi %arg0, %c1_i32 : i32
    %c4_i32 = arith.constant 4 : i32
    %1 = arith.muli %0, %c4_i32 : i32
    %c0_i32 = arith.constant 0 : i32
    %c0_i32_0 = arith.constant 0 : i32
    return %c0_i32, %1 : i32, i32
  }
  func.func @transform_4(%arg0: i32) -> (i32, i32) {
    %c0_i32 = arith.constant 0 : i32
    %c0_i32_0 = arith.constant 0 : i32
    return %c0_i32, %arg0 : i32, i32
  }
}

</mosaic_0001>

<bundles_post_ra>
// kernel: tpu_custom_call.1
= control target key start
LH: loop header
LB: loop body
LE: loop exit
PB: predicated region body
PF: predicated region fallthrough
CT: control target
= control target key end

     0   :  { %s2678_s0 = inlined_call_operand.hbm [shape: f32[8,9], index: 0, kind: input, shape index: {}]   ;;  %s2679_s1 = inlined_call_operand.hbm [shape: f32[8,9], index: 1, kind: input, shape index: {}]   ;;  %s2680_s2 = inlined_call_operand.hbm [shape: f32[4,1152], index: 2, kind: input, shape index: {}]   ;;  %s2681_s3 = inlined_call_operand.hbm [shape: f32[4,1152], index: 3, kind: input, shape index: {}]   ;;  %s2682_s4 = inlined_call_operand.hbm [shape: f32[4,1024], index: 4, kind: output, shape index: {}]  }
   0x1   :  { %2693 = sst [smem:[#allocation18_spill]] %s2678_s0 }
   0x2   :  { %9 = vsyncpa [#allocation3], 0 }
   0x3   :  { %10 = vsyncpa [#allocation6], 0 }
   0x4   :  { %11 = vsyncpa [#allocation4], 0 }
   0x5   :  { %13 = vsyncpa [#allocation4 + $0x1], 0  ;;  %s1852_s15 = smov 0   ;;  %s1854_s16 = smov 0  }
   0x6   :  { %s1856_s17 = smov 0   ;;  %s1858_s18 = smov 0  }
   0x7   :  { %s1860_s19 = smov 0   ;;  %s1862_s20 = smov 0  }
   0x8   :  { %s1864_s21 = smov 0  }
   0x9 LB: > { %s1886_s22 = sadd.s32 4294967295, %s1802_s21   ;;  %s1429_s23 = sadd.s32 4294967294, %s1802_s21   ;;  %s1802_s21 = sphi %s1864_s21, %s2719_s21   ;;  %s1798_s20 = sphi %s1862_s20, %s2727_s20   ;;  %s1794_s19 = sphi %s1860_s19, %s2726_s19   ;;  %s1790_s18 = sphi %s1858_s18, %s2725_s18   ;;  %s1786_s17 = sphi %s1856_s17, %s2724_s17   ;;  %s1782_s16 = sphi %s1854_s16, %s2723_s16   ;;  %s1778_s15 = sphi %s1852_s15, %s2722_s15  }
   0xa   : > { %s1890_s24 = sadd.s32 1, %s1802_s21   ;;  %s68_s25 = sadd.s32 1, %s1798_s20 }
   0xb   : > { %2694 = sst [smem:[#allocation15_spill]] %s1890_s24  ;;  %s65_s26 = ssub.s32 %s1802_s21, %s1890_s24 }
   0xc   : > { %p75_p0 = scmp.ne.s32.totalorder %s1798_s20, %s1794_s19  ;;  %p66_p1 = scmp.eq.s32.totalorder %s65_s26, 0 }
   0xd   : > { %p76_p2 = scmp.eq.s32.totalorder %s1802_s21, 0  ;;  %p81_p3 = scmp.ne.s32.totalorder %s1794_s19, %s1790_s18 }
   0xe   : > { %p2685_p4 = scmp.eq.s32.totalorder %s1886_s22, 0  ;;  %s2684_s30 = sshll.u32 %s1802_s21, 2 }
   0xf   : > { %s1902_s27 = scalar_select %p66_p1, %s1798_s20, %s68_s25  }
  0x10   : > { %p1909_p5 = por %p76_p2, %p75_p0  ;;  %p1918_p6 = por %p2685_p4, %p81_p3 }
  0x11   : > { %2695 = sst [smem:[#allocation16_spill]] %s1902_s27  ;;  %s98_s5 = sadd.s32 1, %s1786_s17 }
  0x12   : > { %s2696_s28 = scalar_select %p1909_p5, 1, 0 }
  0x13   : > { %s2697_s29 = scalar_select %p1918_p6, 1, 0 }
  0x14   : > { %s1457_s6 = sadd.s32 4, %s2684_s30  ;;  %p105_p7 = scmp.ne.s32.totalorder %s1786_s17, %s1782_s16 }
  0x15   : > { %s1459_s7 = sadd.s32 4, %s1457_s6  ;;  %p111_p8 = scmp.ne.s32.totalorder %s1782_s16, %s1778_s15 }
  0x16   : > { %s95_s8 = ssub.s32 %s1457_s6, %s1459_s7  ;;  %p1931_p9 = por %p105_p7, %p76_p2 }
  0x17   : > { %p96_p10 = scmp.eq.s32.totalorder %s95_s8, 0  ;;  %p1937_p11 = por %p111_p8, %p2685_p4 }
  0x18   : > { %s2698_s9 = scalar_select %p1931_p9, 1, 0 }
  0x19   : > { %s2699_s10 = scalar_select %p1937_p11, 1, 0 }
  0x1a   : > { %p135_p12 = scmp.eq.s32.totalorder %s1886_s22, 1  ;;  %p141_p13 = scmp.eq.s32.totalorder %s1429_s23, 1 }
  0x1b   : > { %s1943_s11 = scalar_select %p96_p10, %s1786_s17, %s98_s5  }
  0x1c   : > { %p1948_p1 = por %p135_p12, %p75_p0  ;;  %p1955_p2 = por %p141_p13, %p81_p3 }
  0x1d   : > { %2700 = sst [smem:[#allocation17_spill]] %s1943_s11  ;;  %p1432_p7 = scmp.ge.s32.totalorder %s1802_s21, 1 }
  0x1e   : > { %s2701_s12 = scalar_select %p1948_p1, 1, 0 }
  0x1f   : > { %s2702_s13 = scalar_select %p1955_p2, 1, 0 }
  0x20   : > { %p148_p6 = scmp.lt.s32.totalorder %s1802_s21, 3  ;;  %s1804_s15 = smov [#allocation2]  }
  0x21   : > { %s161_s23 = sshll.u32 %s1804_s15, 4  ;;  %s1805_s25 = smov [#allocation5]   ;;  %s162_s23 = int_to_ptr.vmem [resolvable:$true] %s161_s23 }
  0x22   : > { %p1961_p8 = pnand %p1432_p7, %p148_p6  ;;  %s172_s26 = sshll.u32 %s1805_s25, 4  ;;  %s1973_s26 = int_to_ptr.vmem [resolvable:$true] %s172_s26 }
  0x23   : > { %s2705_s0 = sld [smem:[#allocation18_spill]] }
  0x24   : > { %s2703_s14 = scalar_select %p1961_p8, 1, 0 }
  0x25   : > { %p1477_p10 = pneg %p1961_p8 }
  0x27   : > { %p1969_p0 = pnand %p1477_p10, %p2685_p4 }
  0x29   : > { %s1587_s8 = scalar_lea.hbm %s2705_s0, 128  ;;  %p1589_p6 = pneg %p1969_p0 }
  0x2a   : > { %p1588_p3 = scmp.ne.s32.totalorder %s2705_s0, %s1587_s8  ;;  %p1594_p7 = scmp.lt.u32.totalorder %s1587_s8, %s2705_s0 }
  0x2c   : > { %p1590_p12 = pnand %p1589_p6, %p1588_p3 }
  0x2e   : > { %p1591_p13 = pneg %p1590_p12 }
  0x30   : > { %p1596_p10 = pnand %p1594_p7, %p1591_p13 }
  0x32   : > { %1599 = shalt.err (!%p1596_p10)
}
  0x33   : > { %s1600_s11 = scalar_lea.vmem %s162_s23, 128  ;;  %p1608_p11 = scmp.lt.s32.totalorder %s162_s23, %s162_s23 }
  0x34   : > { %p1601_p4 = scmp.ne.s32.totalorder %s162_s23, %s1600_s11  ;;  %p1609_p8 = scmp.lt.s32.totalorder %s1600_s11, %s1600_s11 }
  0x36   : > { %p1603_p2 = pnand %p1601_p4, %p1589_p6  ;;  %p1610_p9 = por %p1609_p8, %p1608_p11 }
  0x38   : > { %p1604_p1 = pneg %p1603_p2 }
  0x3a   : > { %p1611_p5 = pnand %p1610_p9, %p1604_p1 }
  0x3c   : > { %1614 = shalt.err (!%p1611_p5)
}
  0x3d   : > { %1480 = dma.hbm_to_vmem [thread:$0]  (!%p1969_p0), %s2705_s0, 128, %s162_s23, [#allocation3]  }
  0x3e   : > { %s1615_s8 = scalar_lea.hbm %s2679_s1, 128 }
  0x3f   : > { %p1616_p4 = scmp.ne.s32.totalorder %s2679_s1, %s1615_s8  ;;  %p1622_p5 = scmp.lt.u32.totalorder %s1615_s8, %s2679_s1 }
  0x41   : > { %p1618_p11 = pnand %p1616_p4, %p1589_p6 }
  0x43   : > { %p1619_p9 = pneg %p1618_p11 }
  0x45   : > { %p1624_p1 = pnand %p1622_p5, %p1619_p9 }
  0x47   : > { %1627 = shalt.err (!%p1624_p1)
}
  0x48   : > { %s1628_s23 = scalar_lea.vmem %s1973_s26, 128  ;;  %p1636_p12 = scmp.lt.s32.totalorder %s1973_s26, %s1973_s26 }
  0x49   : > { %p1629_p2 = scmp.ne.s32.totalorder %s1973_s26, %s1628_s23  ;;  %p1637_p13 = scmp.lt.s32.totalorder %s1628_s23, %s1628_s23 }
  0x4b   : > { %p1631_p8 = pnand %p1629_p2, %p1589_p6  ;;  %p1638_p7 = por %p1637_p13, %p1636_p12 }
  0x4d   : > { %p1632_p3 = pneg %p1631_p8 }
  0x4f   : > { %p1639_p10 = pnand %p1638_p7, %p1632_p3 }
  0x51   : > { %1642 = shalt.err (!%p1639_p10)
}
  0x52   : > { %1483 = dma.hbm_to_vmem [thread:$0]  (!%p1969_p0), %s2679_s1, 128, %s1973_s26, [#allocation6]  }
  0x53   : > { %p2692_p4 = scmp.ge.s32.totalorder %s1802_s21, 2 }
  0x54   : > { %p2706_p6 = scmp.ne.s32.totalorder (!%p2692_p4), %s2696_s28, 0 }
  0x55   : > { %179 = sbr.rel (%p2692_p4) target bundleno = 153 (0x99), region = 24 }
  0x5c   : > { %182 = sbr.rel (!%p2706_p6) target bundleno = 126 (0x7e), region = 28  ;;  %s183_s6 = sand.u32 (%p2706_p6), 1, %s1802_s21  }
  0x5d   : > { %s185_s27 = sand.u32 (%p2706_p6), 1, %s1798_s20   ;;  %s2707_s5 = sshll.u32 (%p2706_p6), %s1802_s21, 2 }
  0x5e   : > { %s1436_s7 = sshll.u32 (%p2706_p6), %s185_s27, 4  ;;  %s189_s8 = ssub.s32 (%p2706_p6), 9, %s2707_s5 }
  0x5f   : > { %p190_p11 = scmp.lt.s32.totalorder (%p2706_p6), %s189_s8, 4  ;;  %s2034_s25 = scalar_lea.sflag (%p2706_p6), [#allocation3], %s183_s6 }
  0x60   : > { %s187_s11 = scalar_lea.vmem (%p2706_p6), [#allocation7], %s1436_s7 }
  0x63   : > { %s2729_s8 = smov (!%p190_p11, %s189_s8), 4 }
  0x64   : > { %s2031_s15 = sshll.u32 %s2729_s8, 6 }
  0x65   : > { %s194_s26 = ssub.s32 256, %s2031_s15 }
  0x66   : > { %195 = vsyncadd %s2034_s25, %s194_s26  ;;  %p1439_p0 = scmp.ne.s32.totalorder %s2031_s15, 0  ;;  %s1460_s28 = sshll.u32 %s1802_s21, 8 }
  0x67   : > { %s2042_s30 = scalar_lea.hbm %s2680_s2, %s1460_s28  ;;  %s201_s6 = sshll.u32 %s187_s11, 4  ;;  %s202_s6 = int_to_ptr.vmem [resolvable:$true] %s201_s6 }
  0x68   : > { %s1643_s27 = scalar_lea.hbm %s2042_s30, %s2031_s15  ;;  %s1647_s8 = scalar_lea.hbm %s2680_s2, 576 }
  0x69   : > { %p1644_p9 = scmp.ne.s32.totalorder %s2042_s30, %s1643_s27  ;;  %p1648_p2 = scmp.lt.u32.totalorder %s2042_s30, %s2680_s2 }
  0x6a   : > { %p1649_p8 = scmp.lt.u32.totalorder %s1647_s8, %s1643_s27  ;;  %p1651_p12 = scmp.lt.u32.totalorder %s1643_s27, %s2042_s30 }
  0x6b   : > { %p1645_p5 = pnand %p1644_p9, %p1439_p0 }
  0x6c   : > { %p1650_p3 = por %p1649_p8, %p1648_p2 }
  0x6d   : > { %p1646_p1 = pneg %p1645_p5 }
  0x6e   : > { %p1652_p13 = por %p1651_p12, %p1650_p3 }
  0x70   : > { %p1653_p7 = pnand %p1652_p13, %p1646_p1 }
  0x72   : > { %1656 = shalt.err (!%p1653_p7)
}
  0x73   : > { %s1657_s11 = scalar_lea.vmem %s202_s6, %s2031_s15  ;;  %s1806_s28 = smov [#allocation7]  }
  0x74   : > { %p1658_p10 = scmp.ne.s32.totalorder %s202_s6, %s1657_s11  ;;  %s1661_s23 = sshll.u32 %s1806_s28, 4  ;;  %s1662_s23 = int_to_ptr.vmem [resolvable:$false] %s1661_s23 }
  0x75   : > { %s1663_s24 = scalar_lea.vmem %s1662_s23, 512  ;;  %p1664_p9 = scmp.lt.s32.totalorder %s202_s6, %s1662_s23 }
  0x76   : > { %p1659_p6 = pnand %p1658_p10, %p1439_p0  ;;  %p1665_p5 = scmp.lt.s32.totalorder %s1663_s24, %s1657_s11 }
  0x78   : > { %p1660_p11 = pneg %p1659_p6  ;;  %p1666_p4 = por %p1665_p5, %p1664_p9 }
  0x7a   : > { %p1667_p2 = pnand %p1666_p4, %p1660_p11 }
  0x7c   : > { %1670 = shalt.err (!%p1667_p2)
}
  0x7d   : > { %204 = dma.hbm_to_vmem [thread:$0]  (%p1439_p0), %s2042_s30, %s2031_s15, %s202_s6, %s2034_s25  }
  0x7e PF: > { %s208_s0 = sand.u32 1, %s1802_s21   ;;  %s210_s27 = sand.u32 1, %s1786_s17  }
  0x7f   : > { %s1443_s7 = sshll.u32 %s210_s27, 2  ;;  %s1444_s5 = sshll.u32 %s1802_s21, 8 }
  0x80   : > { %s1353_s11 = scalar_lea.hbm %s2681_s3, %s1444_s5  ;;  %s212_s28 = scalar_lea.vmem [#allocation8], %s1443_s7 }
  0x81   : > { %s221_s23 = sshll.u32 %s212_s28, 4  ;;  %s2071_s24 = scalar_lea.hbm %s1353_s11, 256  ;;  %s222_s23 = int_to_ptr.vmem [resolvable:$true] %s221_s23 }
  0x82   : > { %s209_s15 = scalar_lea.sflag [#allocation3], %s208_s0  ;;  %s1699_s25 = scalar_lea.hbm %s1353_s11, 320 }
  0x83   : > { %p1672_p4 = scmp.ne.s32.totalorder %s2071_s24, %s1699_s25  ;;  %p2708_p0 = scmp.ne.s32.totalorder %s2698_s9, 0 }
  0x84   : > { %s1675_s27 = scalar_lea.hbm %s2681_s3, 576  ;;  %p1676_p3 = scmp.lt.u32.totalorder %s2071_s24, %s2681_s3 }
  0x85   : > { %p1673_p1 = pnand %p1672_p4, %p2708_p0  ;;  %p1677_p12 = scmp.lt.u32.totalorder %s1675_s27, %s1699_s25 }
  0x86   : > { %p1679_p7 = scmp.lt.u32.totalorder %s1699_s25, %s2071_s24 }
  0x87   : > { %p1674_p8 = pneg %p1673_p1  ;;  %p1678_p13 = por %p1677_p12, %p1676_p3 }
  0x89   : > { %p1680_p10 = por %p1679_p7, %p1678_p13 }
  0x8b   : > { %p1681_p6 = pnand %p1680_p10, %p1674_p8 }
  0x8d   : > { %1684 = shalt.err (!%p1681_p6)
}
  0x8e   : > { %s1685_s0 = scalar_lea.vmem %s222_s23, 64  ;;  %s1807_s7 = smov [#allocation8]  }
  0x8f   : > { %p1686_p11 = scmp.ne.s32.totalorder %s222_s23, %s1685_s0  ;;  %s1689_s26 = sshll.u32 %s1807_s7, 4  ;;  %s1690_s26 = int_to_ptr.vmem [resolvable:$false] %s1689_s26 }
  0x90   : > { %s1691_s11 = scalar_lea.vmem %s1690_s26, 128  ;;  %p1692_p2 = scmp.lt.s32.totalorder %s222_s23, %s1690_s26 }
  0x91   : > { %p1687_p9 = pnand %p1686_p11, %p2708_p0  ;;  %p1693_p4 = scmp.lt.s32.totalorder %s1691_s11, %s1685_s0 }
  0x93   : > { %p1688_p5 = pneg %p1687_p9  ;;  %p1694_p1 = por %p1693_p4, %p1692_p2 }
  0x95   : > { %p1695_p3 = pnand %p1694_p1, %p1688_p5 }
  0x97   : > { %1698 = shalt.err (!%p1695_p3)
}
  0x98   : > { %1468 = dma.hbm_to_vmem [thread:$0]  (%p2708_p0), %s2071_s24, 64, %s222_s23, %s209_s15  }
  0x99 PF: > { %p2709_p8 = scmp.ne.s32.totalorder %s2703_s14, 0 }
  0x9a   : > { %p2710_p12 = scmp.eq.s32.totalorder (!%p2709_p8), %s1886_s22, 0 }
  0x9b   : > { %230 = sbr.rel (%p2709_p8) target bundleno = 776 (0x308), region = 36 }
  0xa2   : > { %1757 = dma.done.wait (%p2710_p12), [#allocation3], 128   ;;  %p2711_p13 = pmov %p2710_p12 }
  0xa3   : > { %p2712_p7 = pmov %p2710_p12 }
  0xa4   : > { %1759 = vsyncadd (%p2711_p13), [#allocation3], 4294967168 }
  0xa5   : > { %1761 = dma.done.wait (%p2712_p7), [#allocation6], 128   ;;  %p2713_p10 = pmov %p2712_p7 }
  0xa6   : > { %s240_s9 = sand.u32 1, %s1886_s22   ;;  %s242_s28 = sand.u32 1, %s1794_s19  }
  0xa7   : > { %1763 = vsyncadd (%p2713_p10), [#allocation6], 4294967168  ;;  %s2103_s14 = sshll.u32 %s242_s28, 4  ;;  %s241_s23 = scalar_lea.sflag [#allocation3], %s240_s9 }
  0xa8   : > { %s2106_s24 = scalar_lea.vmem [#allocation7], %s2103_s14  ;;  %p2714_p0 = scmp.ne.s32.totalorder %s2697_s29, 0 }
  0xaa   : > { %1765 = dma.done.wait (%p2714_p0), %s241_s23, 256  }
  0xab   : > { %1767 = vsyncadd (%p2714_p0), %s241_s23, 4294967040  ;;  %s251_s15 = sand.u32 1, %s1782_s16   ;;  %p2715_p6 = scmp.ne.s32.totalorder %s2699_s10, 0 }
  0xac   : > { %s2113_s25 = sshll.u32 %s251_s15, 2 }
  0xad   : > { %s253_s30 = scalar_lea.vmem [#allocation8], %s2113_s25 }
  0xae   : > { %1769 = dma.done.wait (%p2715_p6), %s241_s23, 64  }
  0xaf   : > { %1771 = vsyncadd (%p2715_p6), %s241_s23, 4294967232  ;;  %v1808_v0 = vmov 1   ;;  %v1809_v1 = vmov 0   ;;  %v291_v2 = vld [vmem:[#allocation2] sm:$0xff]  ;;  %v292_v3 = vld [vmem:[#allocation5] sm:$0xff]  ;;  %v1810_v4 = vmov 2  }
  0xb0   : > { %1570 = vset.pattern.permute.xlu1 %v1808_v0  ;;  %1569 = vset.pattern.permute.xlu0 %v1809_v1  ;;  %v1811_v5 = vmov 3   ;;  %v1812_v6 = vmov 4   ;;  %v1813_v7 = vmov 5   ;;  %v1814_v8 = vmov 6   ;;  %v293_v11 = vld [vmem:[%s2106_s24] sm:$0xff]  ;;  %s1817_s29 = smov 1  }
  0xb1   : > { %330 = vperm.xlu1 %1570, %v291_v2   ;;  %309 = vperm.xlu0 %1569, %v291_v2   ;;  %v1815_v9 = vmov 8   ;;  %v1816_v10 = vmov 7   ;;  %v299_v12 = vcombine.low %v293_v11, %v293_v11  ;;  %v297_v13 = vcombine.high %v293_v11, %v293_v11  ;;  %v294_v14 = vld [vmem:[%s2106_s24 + $0x8] sm:$0xf]  ;;  %s1818_s10 = smov 2   ;;  %s1819_s6 = smov 3  }
  0xb2   : > { %vm303_vm0 = vcmask 1043456   ;;  %v300_v17 = vcombine.low %v294_v14, %v294_v14  ;;  %v842_v42 = vld [vmem:[%s2106_s24 + $0x8] sm:$0xff]  ;;  %v843_v46 = vld [vmem:[%s253_s30] sm:$0xf]  ;;  %s1820_s27 = smov 4   ;;  %s1821_s8 = smov 5  }
  0xb3   : > { %v2123_v15 = vsel %vm303_vm0, %v293_v11, %v299_v12  ;;  %v2126_v16 = vsel %vm303_vm0, %v297_v13, %v293_v11  ;;  %v848_v45 = vrot.slane %v842_v42, 4  ;;  %v2174_v47 = vcombine.high %v842_v42, %v842_v42  ;;  %s1822_s5 = smov 6   ;;  %s1823_s0 = smov 7  }
  0xb4   : > { %v2133_v22 = vsel %vm303_vm0, %v294_v14, %v300_v17  ;;  %v850_v49 = vrot.slane %v843_v46, 4  ;;  %vm345_vm1 = vcmask 7168   ;;  %vm394_vm2 = vcmask 15360   ;;  %s1824_s7 = smov 8   ;;  %s1825_s26 = smov 120  }
  0xb5   : > { %320 = vperm.xlu0 %1569, %v292_v3   ;;  %1572 = vset.pattern.permute.xlu1 %v1810_v4  ;;  %v2179_v48 = vsel %vm303_vm0, %v842_v42, %v848_v45  ;;  %vm443_vm3 = vcmask 23552   ;;  %vm492_vm4 = vcmask 31744   ;;  %vm541_vm5 = vcmask 39936   ;;  %s282_s11 = scalar_lea.vmem [#allocation9], %s2103_s14  ;;  %s1461_s23 = sshll.u32 %s1886_s22, 8 }
  0xb6   : > { %379 = vperm.xlu1 %1572, %v291_v2   ;;  %v2186_v52 = vsel %vm303_vm0, %v843_v46, %v850_v49  ;;  %vm590_vm6 = vcmask 48128   ;;  %vm639_vm7 = vcmask 56320   ;;  %vm711_vm8 = vcmask 1043520   ;;  %s1319_s9 = sshll.u32 %s282_s11, 4  ;;  %s2624_s25 = scalar_lea.hbm %s2682_s4, %s1461_s23  ;;  %s2626_s9 = int_to_ptr.vmem [resolvable:$true] %s1319_s9 }
  0xb7   : > { %vm684_vm9 = vcmask 64512   ;;  %vm726_vm10 = vcmask 60416   ;;  %vm819_vm11 = vcmask 1041408   ;;  %vm815_vm12 = vcmask 1040384   ;;  %s1305_s14 = scalar_lea.sflag [#allocation4], %s242_s28  ;;  %s1700_s30 = scalar_lea.vmem %s2626_s9, 256 }
  0xb8   : > { %vm823_vm13 = vcmask 1042432   ;;  %vm838_vm14 = vcmask 982016   ;;  %p1701_p11 = scmp.ne.s32.totalorder %s2626_s9, %s1700_s30  ;;  %p2716_p9 = scmp.ne.s32.totalorder %s2701_s12, 0 }
  0xb9   : > { %1571 = vset.pattern.permute.xlu0 %v1808_v0  ;;  %s1826_s22 = smov [#allocation9]  }
  0xba   : > { %355 = vperm.xlu0 %1571, %v292_v3   ;;  %404 = vperm.xlu1 %1572, %v292_v3   ;;  %p1702_p5 = pnand %p1701_p11, %p2716_p9 }
  0xbc   : > { %p1703_p2 = pneg %p1702_p5 }
  0xbe   : > { %1573 = vset.pattern.permute.xlu1 %v1811_v5  ;;  %1574 = vset.pattern.permute.xlu0 %v1811_v5 }
  0xbf   : > { %428 = vperm.xlu1 %1573, %v291_v2   ;;  %453 = vperm.xlu0 %1574, %v292_v3  }
  0xc3   : > { %1575 = vset.pattern.permute.xlu1 %v1812_v6  ;;  %1576 = vset.pattern.permute.xlu0 %v1813_v7 }
  0xc4   : > { %477 = vperm.xlu1 %1575, %v291_v2   ;;  %526 = vperm.xlu0 %1576, %v291_v2  }
  0xc8   : > { %502 = vperm.xlu1 %1575, %v292_v3   ;;  %1579 = vset.pattern.permute.xlu0 %v1814_v8 }
  0xc9   : > { %600 = vperm.xlu0 %1579, %v292_v3  }
  0xcc   : > { %1577 = vset.pattern.permute.xlu1 %v1813_v7 }
  0xcd   : > { %551 = vperm.xlu1 %1577, %v292_v3   ;;  %1581 = vset.pattern.permute.xlu0 %v1815_v9 }
  0xce   : > { %673 = vperm.xlu0 %1581, %v291_v2  }
  0xd1   : > { %1578 = vset.pattern.permute.xlu1 %v1814_v8 }
  0xd2   : > { %575 = vperm.xlu1 %1578, %v291_v2  }
  0xd6   : > { %1580 = vset.pattern.permute.xlu1 %v1816_v10 }
  0xd7   : > { %624 = vperm.xlu1 %1580, %v291_v2  }
  0xdb   : > { %649 = vperm.xlu1 %1580, %v292_v3  }
  0xdf   : > { %1582 = vset.pattern.permute.xlu1 %v1815_v9 }
  0xe0   : > { %693 = vperm.xlu1 %1582, %v292_v3  }
 0x130   : > { %v331_v18 = vpop.permute.xlu1 %330  ;;  %v2128_v19 = vpop.permute.xlu0 %309 }
 0x131   : > { %v333_v20 = vmul.f32 %v331_v18, %v2123_v15  ;;  %v334_v21 = vmul.f32 %v331_v18, %v2126_v16  ;;  %v335_v23 = vmul.f32 %v331_v18, %v2133_v22  ;;  %v870_v50 = vmul.f32 %v2174_v47, %v331_v18 }
 0x132   : > { %v869_v51 = vmul.f32 %v2179_v48, %v331_v18  ;;  %v871_v54 = vmul.f32 %v2186_v52, %v331_v18  ;;  %v312_v42 = vmul.f32 %v2128_v19, %v2123_v15 }
 0x133   : > { %339 = vrot.lane.b32.xlu1 %v333_v20, %s1817_s29  ;;  %341 = vrot.lane.b32.xlu0 %v334_v21, %s1817_s29 }
 0x134   : > { %v2138_v24 = vpop.permute.xlu0 %320 }
 0x135   : > { %v380_v28 = vpop.permute.xlu1 %379 }
 0x136   : > { %v382_v29 = vmul.f32 %v380_v28, %v2123_v15  ;;  %v384_v32 = vmul.f32 %v380_v28, %v2133_v22  ;;  %v383_v33 = vmul.f32 %v380_v28, %v2126_v16  ;;  %v909_v55 = vmul.f32 %v2179_v48, %v380_v28 }
 0x137   : > { %343 = vrot.lane.b32.xlu1 %v335_v23, %s1817_s29  ;;  %v910_v58 = vmul.f32 %v2174_v47, %v380_v28  ;;  %v911_v60 = vmul.f32 %v2186_v52, %v380_v28 }
 0x139   : > { %v356_v25 = vpop.permute.xlu0 %355  ;;  %v405_v31 = vpop.permute.xlu1 %404 }
 0x13a   : > { %v360_v26 = vmul.f32 %v356_v25, %v2133_v22  ;;  %v358_v27 = vmul.f32 %v356_v25, %v2123_v15  ;;  %v359_v30 = vmul.f32 %v356_v25, %v2126_v16  ;;  %v407_v35 = vmul.f32 %v405_v31, %v2123_v15 }
 0x13b   : > { %v408_v36 = vmul.f32 %v405_v31, %v2126_v16  ;;  %v409_v38 = vmul.f32 %v405_v31, %v2133_v22  ;;  %v889_v53 = vmul.f32 %v2179_v48, %v356_v25  ;;  %v890_v56 = vmul.f32 %v2174_v47, %v356_v25 }
 0x13c   : > { %368 = vrot.lane.b32.xlu0 %v360_v26, %s1817_s29  ;;  %364 = vrot.lane.b32.xlu1 %v358_v27, %s1817_s29  ;;  %v891_v57 = vmul.f32 %v2186_v52, %v356_v25  ;;  %v929_v59 = vmul.f32 %v2179_v48, %v405_v31  ;;  %v930_v63 = vmul.f32 %v2174_v47, %v405_v31 }
 0x13d   : > { %v931_v3 = vmul.f32 %v2186_v52, %v405_v31 }
 0x13e   : > { %v429_v34 = vpop.permute.xlu1 %428  ;;  %v2163_v41 = vpop.permute.xlu0 %453 }
 0x13f   : > { %v431_v37 = vmul.f32 %v429_v34, %v2123_v15  ;;  %v432_v39 = vmul.f32 %v429_v34, %v2126_v16  ;;  %v433_v40 = vmul.f32 %v429_v34, %v2133_v22  ;;  %v457_v43 = vmul.f32 %v2163_v41, %v2126_v16 }
 0x140   : > { %388 = vrot.lane.b32.xlu0 %v382_v29, %s1818_s10  ;;  %366 = vrot.lane.b32.xlu1 %v359_v30, %s1817_s29  ;;  %v456_v44 = vmul.f32 %v2163_v41, %v2123_v15  ;;  %v949_v62 = vmul.f32 %v2179_v48, %v429_v34  ;;  %v950_v1 = vmul.f32 %v2174_v47, %v429_v34 }
 0x141   : > { %v969_v4 = vmul.f32 %v2179_v48, %v2163_v41  ;;  %v951_v5 = vmul.f32 %v2186_v52, %v429_v34  ;;  %v970_v7 = vmul.f32 %v2174_v47, %v2163_v41  ;;  %v458_v8 = vmul.f32 %v2163_v41, %v2133_v22 }
 0x142   : > { %v971_v21 = vmul.f32 %v2186_v52, %v2163_v41 }
 0x143   : > { %v478_v61 = vpop.permute.xlu1 %477  ;;  %v527_v11 = vpop.permute.xlu0 %526 }
 0x144   : > { %392 = vrot.lane.b32.xlu0 %v384_v32, %s1818_s10  ;;  %390 = vrot.lane.b32.xlu1 %v383_v33, %s1818_s10  ;;  %v480_v0 = vmul.f32 %v478_v61, %v2123_v15  ;;  %v481_v2 = vmul.f32 %v478_v61, %v2126_v16  ;;  %v989_v6 = vmul.f32 %v2179_v48, %v478_v61 }
 0x145   : > { %v990_v9 = vmul.f32 %v2174_v47, %v478_v61  ;;  %v482_v13 = vmul.f32 %v478_v61, %v2133_v22  ;;  %v529_v14 = vmul.f32 %v527_v11, %v2123_v15  ;;  %v530_v20 = vmul.f32 %v527_v11, %v2126_v16 }
 0x146   : > { %v991_v25 = vmul.f32 %v2186_v52, %v478_v61  ;;  %v1029_v28 = vmul.f32 %v2179_v48, %v527_v11  ;;  %v1030_v30 = vmul.f32 %v2174_v47, %v527_v11  ;;  %v531_v34 = vmul.f32 %v527_v11, %v2133_v22 }
 0x147   : > { %v503_v10 = vpop.permute.xlu1 %502 }
 0x148   : > { %413 = vrot.lane.b32.xlu0 %v407_v35, %s1818_s10  ;;  %415 = vrot.lane.b32.xlu1 %v408_v36, %s1818_s10  ;;  %v505_v12 = vmul.f32 %v503_v10, %v2123_v15  ;;  %v506_v17 = vmul.f32 %v503_v10, %v2126_v16  ;;  %v1009_v26 = vmul.f32 %v2179_v48, %v503_v10  ;;  %v2264_v33 = vpop.permute.xlu0 %600 }
 0x149   : > { %v1010_v27 = vmul.f32 %v2174_v47, %v503_v10  ;;  %v507_v31 = vmul.f32 %v503_v10, %v2133_v22  ;;  %v1011_v41 = vmul.f32 %v2186_v52, %v503_v10 }
 0x14c   : > { %417 = vrot.lane.b32.xlu0 %v409_v38, %s1818_s10  ;;  %437 = vrot.lane.b32.xlu1 %v431_v37, %s1819_s6  ;;  %v2237_v18 = vpop.permute.xlu1 %551 }
 0x14d   : > { %v554_v35 = vmul.f32 %v2237_v18, %v2123_v15  ;;  %v555_v36 = vmul.f32 %v2237_v18, %v2126_v16 }
 0x150   : > { %439 = vrot.lane.b32.xlu0 %v432_v39, %s1819_s6  ;;  %441 = vrot.lane.b32.xlu1 %v433_v40, %s1819_s6  ;;  %v2277_v39 = vpop.permute.xlu0 %673 }
 0x151   : > { %v2246_v23 = vpop.permute.xlu1 %575 }
 0x152   : > { %v578_v37 = vmul.f32 %v2246_v23, %v2123_v15  ;;  %v579_v40 = vmul.f32 %v2246_v23, %v2126_v16 }
 0x154   : > { %464 = vrot.lane.b32.xlu1 %v457_v43, %s1819_s6  ;;  %462 = vrot.lane.b32.xlu0 %v456_v44, %s1819_s6  ;;  %v313_v44 = vmul.f32 %v2128_v19, %v2126_v16 }
 0x156   : > { %v2254_v29 = vpop.permute.xlu1 %624 }
 0x158   : > { %877 = vrot.lane.b32.xlu1 %v870_v50, %s1817_s29  ;;  %875 = vrot.lane.b32.xlu0 %v869_v51, %s1817_s29  ;;  %v1031_v50 = vmul.f32 %v2186_v52, %v527_v11  ;;  %v1049_v51 = vmul.f32 %v2179_v48, %v2237_v18 }
 0x15a   : > { %v2262_v32 = vpop.permute.xlu1 %649 }
 0x15c   : > { %895 = vrot.lane.b32.xlu1 %v889_v53, %s1817_s29  ;;  %879 = vrot.lane.b32.xlu0 %v871_v54, %s1817_s29 }
 0x15f   : > { %v2275_v38 = vpop.permute.xlu1 %693 }
 0x160   : > { %915 = vrot.lane.b32.xlu1 %v909_v55, %s1818_s10  ;;  %897 = vrot.lane.b32.xlu0 %v890_v56, %s1817_s29  ;;  %v314_v55 = vmul.f32 %v2128_v19, %v2133_v22 }
 0x164   : > { %899 = vrot.lane.b32.xlu1 %v891_v57, %s1817_s29  ;;  %917 = vrot.lane.b32.xlu0 %v910_v58, %s1818_s10  ;;  %v1050_v57 = vmul.f32 %v2174_v47, %v2237_v18  ;;  %v1069_v58 = vmul.f32 %v2179_v48, %v2246_v23  ;;  %s1704_s29 = sshll.u32 %s1826_s22, 4  ;;  %s1705_s29 = int_to_ptr.vmem [resolvable:$false] %s1704_s29 }
 0x165   : > { %p1707_p4 = scmp.lt.s32.totalorder %s2626_s9, %s1705_s29 }
 0x168   : > { %935 = vrot.lane.b32.xlu1 %v929_v59, %s1818_s10  ;;  %919 = vrot.lane.b32.xlu0 %v911_v60, %s1818_s10  ;;  %v323_v60 = vmul.f32 %v2138_v24, %v2123_v15 }
 0x16c   : > { %955 = vrot.lane.b32.xlu1 %v949_v62, %s1819_s6  ;;  %937 = vrot.lane.b32.xlu0 %v930_v63, %s1818_s10  ;;  %v1070_v63 = vmul.f32 %v2174_v47, %v2246_v23 }
 0x170   : > { %486 = vrot.lane.b32.xlu1 %v480_v0, %s1820_s27  ;;  %957 = vrot.lane.b32.xlu0 %v950_v1, %s1819_s6  ;;  %v556_v0 = vmul.f32 %v2237_v18, %v2133_v22 }
 0x174   : > { %939 = vrot.lane.b32.xlu1 %v931_v3, %s1818_s10  ;;  %488 = vrot.lane.b32.xlu0 %v481_v2, %s1820_s27  ;;  %v324_v2 = vmul.f32 %v2138_v24, %v2126_v16  ;;  %v325_v3 = vmul.f32 %v2138_v24, %v2133_v22  ;;  %s1706_s10 = scalar_lea.vmem %s1705_s29, 512 }
 0x175   : > { %p1708_p1 = scmp.lt.s32.totalorder %s1706_s10, %s1700_s30 }
 0x177   : > { %p1709_p3 = por %p1708_p1, %p1707_p4 }
 0x178   : > { %975 = vrot.lane.b32.xlu1 %v969_v4, %s1819_s6  ;;  %959 = vrot.lane.b32.xlu0 %v951_v5, %s1819_s6 }
 0x179   : > { %p1710_p8 = pnand %p1709_p3, %p1703_p2 }
 0x17c   : > { %995 = vrot.lane.b32.xlu1 %v989_v6, %s1820_s27  ;;  %977 = vrot.lane.b32.xlu0 %v970_v7, %s1819_s6  ;;  %v580_v6 = vmul.f32 %v2246_v23, %v2133_v22  ;;  %v603_v7 = vmul.f32 %v2264_v33, %v2123_v15 }
 0x180   : > { %466 = vrot.lane.b32.xlu1 %v458_v8, %s1819_s6  ;;  %997 = vrot.lane.b32.xlu0 %v990_v9, %s1820_s27 }
 0x184   : > { %511 = vrot.lane.b32.xlu1 %v505_v12, %s1820_s27  ;;  %490 = vrot.lane.b32.xlu0 %v482_v13, %s1820_s27 }
 0x188   : > { %513 = vrot.lane.b32.xlu0 %v506_v17, %s1820_s27  ;;  %535 = vrot.lane.b32.xlu1 %v529_v14, %s1821_s8  ;;  %v604_v17 = vmul.f32 %v2264_v33, %v2126_v16 }
 0x18c   : > { %537 = vrot.lane.b32.xlu0 %v530_v20, %s1821_s8  ;;  %979 = vrot.lane.b32.xlu1 %v971_v21, %s1819_s6  ;;  %v627_v20 = vmul.f32 %v2254_v29, %v2123_v15 }
 0x190   : > { %999 = vrot.lane.b32.xlu0 %v991_v25, %s1820_s27  ;;  %1015 = vrot.lane.b32.xlu1 %v1009_v26, %s1820_s27 }
 0x194   : > { %1017 = vrot.lane.b32.xlu0 %v1010_v27, %s1820_s27  ;;  %1035 = vrot.lane.b32.xlu1 %v1029_v28, %s1821_s8 }
 0x198   : > { %1037 = vrot.lane.b32.xlu0 %v1030_v30, %s1821_s8  ;;  %515 = vrot.lane.b32.xlu1 %v507_v31, %s1820_s27  ;;  %v628_v31 = vmul.f32 %v2254_v29, %v2126_v16 }
 0x19c   : > { %539 = vrot.lane.b32.xlu0 %v531_v34, %s1821_s8  ;;  %560 = vrot.lane.b32.xlu1 %v554_v35, %s1821_s8  ;;  %v1051_v34 = vmul.f32 %v2186_v52, %v2237_v18 }
 0x1a0   : > { %562 = vrot.lane.b32.xlu0 %v555_v36, %s1821_s8  ;;  %584 = vrot.lane.b32.xlu1 %v578_v37, %s1822_s5 }
 0x1a4   : > { %586 = vrot.lane.b32.xlu0 %v579_v40, %s1822_s5  ;;  %1019 = vrot.lane.b32.xlu1 %v1011_v41, %s1820_s27 }
 0x1a5   : > { %v340_v43 = vpop.permute.xlu1 %339  ;;  %v342_v45 = vpop.permute.xlu0 %341 }
 0x1a6   : > { %v351_v46 = vadd.f32 %v340_v43, %v312_v42  ;;  %v346_v49 = vsel %vm345_vm1, %v340_v43, %v342_v45  ;;  %v1071_v42 = vmul.f32 %v2186_v52, %v2246_v23  ;;  %v1089_v43 = vmul.f32 %v2179_v48, %v2264_v33 }
 0x1a7   : > { %v352_v53 = vadd.f32 %v346_v49, %v313_v44  ;;  %v1109_v23 = vmul.f32 %v2179_v48, %v2254_v29 }
 0x1a8   : > { %1039 = vrot.lane.b32.xlu0 %v1031_v50, %s1821_s8  ;;  %1055 = vrot.lane.b32.xlu1 %v1049_v51, %s1821_s8  ;;  %v1090_v50 = vmul.f32 %v2174_v47, %v2264_v33 }
 0x1a9   : > { %v344_v54 = vpop.permute.xlu1 %343 }
 0x1aa   : > { %v347_v56 = vsel %vm345_vm1, %v342_v45, %v344_v54 }
 0x1ab   : > { %v353_v59 = vadd.f32 %v347_v56, %v314_v55 }
 0x1ac   : > { %1057 = vrot.lane.b32.xlu0 %v1050_v57, %s1821_s8  ;;  %1075 = vrot.lane.b32.xlu1 %v1069_v58, %s1822_s5  ;;  %v1110_v58 = vmul.f32 %v2174_v47, %v2254_v29 }
 0x1ae   : > { %v365_v61 = vpop.permute.xlu1 %364  ;;  %v369_v62 = vpop.permute.xlu0 %368 }
 0x1af   : > { %v375_v1 = vadd.f32 %v365_v61, %v323_v60 }
 0x1b0   : > { %1077 = vrot.lane.b32.xlu0 %v1070_v63, %s1822_s5  ;;  %564 = vrot.lane.b32.xlu1 %v556_v0, %s1821_s8  ;;  %v857_v63 = vmul.f32 %v2179_v48, %v2128_v19 }
 0x1b2   : > { %v367_v4 = vpop.permute.xlu1 %366  ;;  %v389_v5 = vpop.permute.xlu0 %388 }
 0x1b3   : > { %v370_v8 = vsel %vm345_vm1, %v365_v61, %v367_v4  ;;  %v371_v9 = vsel %vm345_vm1, %v367_v4, %v369_v62  ;;  %v400_v10 = vadd.f32 %v389_v5, %v351_v46  ;;  %v652_v4 = vmul.f32 %v2262_v32, %v2123_v15 }
 0x1b4   : > { %v376_v11 = vadd.f32 %v370_v8, %v324_v2  ;;  %v377_v12 = vadd.f32 %v371_v9, %v325_v3  ;;  %588 = vrot.lane.b32.xlu0 %v580_v6, %s1822_s5  ;;  %609 = vrot.lane.b32.xlu1 %v603_v7, %s1822_s5  ;;  %v629_v3 = vmul.f32 %v2254_v29, %v2133_v22 }
 0x1b5   : > { %v863_v8 = vmul.f32 %v2179_v48, %v2138_v24  ;;  %v676_v9 = vmul.f32 %v2277_v39, %v2123_v15 }
 0x1b6   : > { %v391_v13 = vpop.permute.xlu1 %390  ;;  %v393_v14 = vpop.permute.xlu0 %392 }
 0x1b7   : > { %v395_v21 = vsel %vm394_vm2, %v389_v5, %v391_v13  ;;  %v396_v25 = vsel %vm394_vm2, %v391_v13, %v393_v14  ;;  %v653_v13 = vmul.f32 %v2262_v32, %v2126_v16 }
 0x1b8   : > { %v401_v26 = vadd.f32 %v395_v21, %v352_v53  ;;  %v402_v27 = vadd.f32 %v396_v25, %v353_v59  ;;  %611 = vrot.lane.b32.xlu0 %v604_v17, %s1822_s5  ;;  %633 = vrot.lane.b32.xlu1 %v627_v20, %s1823_s0  ;;  %v605_v59 = vmul.f32 %v2264_v33, %v2133_v22 }
 0x1b9   : > { %v864_v25 = vmul.f32 %v2174_v47, %v2138_v24 }
 0x1ba   : > { %v416_v28 = vpop.permute.xlu1 %415  ;;  %v414_v30 = vpop.permute.xlu0 %413 }
 0x1bb   : > { %v419_v35 = vsel %vm394_vm2, %v414_v30, %v416_v28  ;;  %v424_v36 = vadd.f32 %v414_v30, %v375_v1  ;;  %v858_v1 = vmul.f32 %v2174_v47, %v2128_v19 }
 0x1bc   : > { %v425_v37 = vadd.f32 %v419_v35, %v376_v11  ;;  %635 = vrot.lane.b32.xlu0 %v628_v31, %s1823_s0  ;;  %1059 = vrot.lane.b32.xlu1 %v1051_v34, %s1821_s8  ;;  %v859_v11 = vmul.f32 %v2186_v52, %v2128_v19  ;;  %v677_v19 = vmul.f32 %v2277_v39, %v2126_v16 }
 0x1bd   : > { %v865_v34 = vmul.f32 %v2186_v52, %v2138_v24  ;;  %v1149_v24 = vmul.f32 %v2179_v48, %v2277_v39 }
 0x1be   : > { %v438_v40 = vpop.permute.xlu1 %437  ;;  %v418_v41 = vpop.permute.xlu0 %417 }
 0x1bf   : > { %v2344_v44 = vadd.f32 %v438_v40, %v400_v10  ;;  %v420_v18 = vsel %vm394_vm2, %v416_v28, %v418_v41 }
 0x1c0   : > { %v2347_v45 = vadd.f32 %v420_v18, %v377_v12  ;;  %1079 = vrot.lane.b32.xlu0 %v1071_v42, %s1822_s5  ;;  %1095 = vrot.lane.b32.xlu1 %v1089_v43, %s1822_s5 }
 0x1c2   : > { %v442_v46 = vpop.permute.xlu1 %441  ;;  %v440_v49 = vpop.permute.xlu0 %439 }
 0x1c3   : > { %v444_v51 = vsel %vm443_vm3, %v438_v40, %v440_v49  ;;  %v445_v53 = vsel %vm443_vm3, %v440_v49, %v442_v46  ;;  %v1129_v40 = vmul.f32 %v2179_v48, %v2262_v32 }
 0x1c4   : > { %v2357_v54 = vadd.f32 %v444_v51, %v401_v26  ;;  %v2359_v55 = vadd.f32 %v445_v53, %v402_v27  ;;  %1097 = vrot.lane.b32.xlu0 %v1090_v50, %s1822_s5  ;;  %1115 = vrot.lane.b32.xlu1 %v1109_v23, %s1823_s0  ;;  %v1091_v27 = vmul.f32 %v2186_v52, %v2264_v33 }
 0x1c5   : > { %v1150_v51 = vmul.f32 %v2174_v47, %v2277_v39 }
 0x1c6   : > { %v2363_v56 = vpop.permute.xlu1 %464  ;;  %v463_v57 = vpop.permute.xlu0 %462 }
 0x1c7   : > { %v468_v60 = vsel %vm443_vm3, %v463_v57, %v2363_v56  ;;  %v2371_v61 = vadd.f32 %v463_v57, %v424_v36 }
 0x1c8   : > { %v2373_v62 = vadd.f32 %v468_v60, %v425_v37  ;;  %1117 = vrot.lane.b32.xlu0 %v1110_v58, %s1823_s0  ;;  %613 = vrot.lane.b32.xlu1 %v605_v59, %s1822_s5  ;;  %v1111_v37 = vmul.f32 %v2186_v52, %v2254_v29  ;;  %v1130_v29 = vmul.f32 %v2174_v47, %v2262_v32 }
 0x1c9   : > { %v654_v58 = vmul.f32 %v2262_v32, %v2133_v22 }
 0x1ca   : > { %v878_v0 = vpop.permute.xlu1 %877  ;;  %v876_v2 = vpop.permute.xlu0 %875 }
 0x1cb   : > { %v881_v5 = vsel %vm345_vm1, %v876_v2, %v878_v0  ;;  %v886_v6 = vadd.f32 %v876_v2, %v857_v63 }
 0x1cc   : > { %v887_v7 = vadd.f32 %v881_v5, %v858_v1  ;;  %637 = vrot.lane.b32.xlu0 %v629_v3, %s1823_s0  ;;  %658 = vrot.lane.b32.xlu1 %v652_v4, %s1823_s0  ;;  %v697_v1 = vmul.f32 %v2275_v38, %v2126_v16  ;;  %v1164_v5 = vmul.f32 %v2179_v48, %v2275_v38 }
 0x1cd   : > { %v1131_v16 = vmul.f32 %v2186_v52, %v2262_v32 }
 0x1ce   : > { %v896_v10 = vpop.permute.xlu1 %895  ;;  %v880_v12 = vpop.permute.xlu0 %879 }
 0x1cf   : > { %v906_v14 = vadd.f32 %v896_v10, %v863_v8  ;;  %v882_v17 = vsel %vm345_vm1, %v878_v0, %v880_v12  ;;  %v696_v0 = vmul.f32 %v2275_v38, %v2123_v15 }
 0x1d0   : > { %v888_v20 = vadd.f32 %v882_v17, %v859_v11  ;;  %660 = vrot.lane.b32.xlu0 %v653_v13, %s1823_s0  ;;  %680 = vrot.lane.b32.xlu1 %v676_v9, %s1824_s7 }
 0x1d2   : > { %v916_v21 = vpop.permute.xlu1 %915  ;;  %v898_v26 = vpop.permute.xlu0 %897 }
 0x1d3   : > { %v926_v28 = vadd.f32 %v916_v21, %v886_v6  ;;  %v901_v30 = vsel %vm345_vm1, %v896_v10, %v898_v26  ;;  %v1165_v10 = vmul.f32 %v2174_v47, %v2275_v38 }
 0x1d4   : > { %v907_v31 = vadd.f32 %v901_v30, %v864_v25  ;;  %682 = vrot.lane.b32.xlu0 %v677_v19, %s1824_s7  ;;  %1099 = vrot.lane.b32.xlu1 %v1091_v27, %s1822_s5 }
 0x1d6   : > { %v900_v35 = vpop.permute.xlu1 %899  ;;  %v918_v36 = vpop.permute.xlu0 %917 }
 0x1d7   : > { %v902_v33 = vsel %vm345_vm1, %v898_v26, %v900_v35  ;;  %v921_v41 = vsel %vm394_vm2, %v916_v21, %v918_v36 }
 0x1d8   : > { %v908_v42 = vadd.f32 %v902_v33, %v865_v34  ;;  %v927_v43 = vadd.f32 %v921_v41, %v887_v7  ;;  %1119 = vrot.lane.b32.xlu0 %v1111_v37, %s1823_s0  ;;  %1135 = vrot.lane.b32.xlu1 %v1129_v40, %s1823_s0 }
 0x1da   : > { %v936_v18 = vpop.permute.xlu1 %935  ;;  %v920_v46 = vpop.permute.xlu0 %919 }
 0x1db   : > { %v946_v49 = vadd.f32 %v936_v18, %v906_v14  ;;  %v922_v50 = vsel %vm394_vm2, %v918_v36, %v920_v46 }
 0x1dc   : > { %v928_v23 = vadd.f32 %v922_v50, %v888_v20  ;;  %1137 = vrot.lane.b32.xlu0 %v1130_v29, %s1823_s0  ;;  %1153 = vrot.lane.b32.xlu1 %v1149_v24, %s1824_s7 }
 0x1de   : > { %v956_v53 = vpop.permute.xlu1 %955  ;;  %v938_v57 = vpop.permute.xlu0 %937 }
 0x1df   : > { %v966_v59 = vadd.f32 %v956_v53, %v926_v28  ;;  %v941_v60 = vsel %vm394_vm2, %v936_v18, %v938_v57 }
 0x1e0   : > { %v947_v63 = vadd.f32 %v941_v60, %v907_v31  ;;  %1155 = vrot.lane.b32.xlu0 %v1150_v51, %s1824_s7  ;;  %662 = vrot.lane.b32.xlu1 %v654_v58, %s1823_s0 }
 0x1e2   : > { %v487_v39 = vpop.permute.xlu1 %486  ;;  %v958_v2 = vpop.permute.xlu0 %957 }
 0x1e3   : > { %v498_v3 = vadd.f32 %v487_v39, %v2344_v44  ;;  %v961_v22 = vsel %vm443_vm3, %v956_v53, %v958_v2 }
 0x1e4   : > { %v967_v4 = vadd.f32 %v961_v22, %v927_v43  ;;  %700 = vrot.lane.b32.xlu0 %v696_v0, %s1824_s7  ;;  %702 = vrot.lane.b32.xlu1 %v697_v1, %s1824_s7 }
 0x1e6   : > { %v940_v6 = vpop.permute.xlu1 %939  ;;  %v489_v15 = vpop.permute.xlu0 %488 }
 0x1e7   : > { %v942_v7 = vsel %vm394_vm2, %v938_v57, %v940_v6  ;;  %v493_v44 = vsel %vm492_vm4, %v487_v39, %v489_v15 }
 0x1e8   : > { %v948_v8 = vadd.f32 %v942_v7, %v908_v42  ;;  %v499_v9 = vadd.f32 %v493_v44, %v2357_v54  ;;  %1139 = vrot.lane.b32.xlu0 %v1131_v16, %s1823_s0  ;;  %1168 = vrot.lane.b32.xlu1 %v1164_v5, %s1824_s7 }
 0x1ea   : > { %v976_v48 = vpop.permute.xlu1 %975  ;;  %v960_v11 = vpop.permute.xlu0 %959 }
 0x1eb   : > { %v986_v12 = vadd.f32 %v976_v48, %v946_v49  ;;  %v962_v13 = vsel %vm443_vm3, %v958_v2, %v960_v11 }
 0x1ec   : > { %v968_v52 = vadd.f32 %v962_v13, %v928_v23  ;;  %1170 = vrot.lane.b32.xlu0 %v1165_v10, %s1824_s7 }
 0x1ee   : > { %v996_v32 = vpop.permute.xlu1 %995  ;;  %v978_v14 = vpop.permute.xlu0 %977 }
 0x1ef   : > { %v1006_v17 = vadd.f32 %v996_v32, %v966_v59  ;;  %v981_v54 = vsel %vm443_vm3, %v976_v48, %v978_v14 }
 0x1f0   : > { %v987_v20 = vadd.f32 %v981_v54, %v947_v63 }
 0x1f2   : > { %v467_v21 = vpop.permute.xlu1 %466  ;;  %v998_v25 = vpop.permute.xlu0 %997 }
 0x1f3   : > { %v469_v26 = vsel %vm443_vm3, %v2363_v56, %v467_v21  ;;  %v1001_v47 = vsel %vm492_vm4, %v996_v32, %v998_v25 }
 0x1f4   : > { %v475_v38 = vadd.f32 %v469_v26, %v2347_v45  ;;  %v1007_v19 = vadd.f32 %v1001_v47, %v967_v4 }
 0x1f6   : > { %v512_v27 = vpop.permute.xlu1 %511  ;;  %v491_v28 = vpop.permute.xlu0 %490 }
 0x1f7   : > { %v522_v30 = vadd.f32 %v512_v27, %v2371_v61  ;;  %v494_v31 = vsel %vm492_vm4, %v489_v15, %v491_v28 }
 0x1f8   : > { %v500_v34 = vadd.f32 %v494_v31, %v2359_v55 }
 0x1fa   : > { %v536_v35 = vpop.permute.xlu1 %535  ;;  %v514_v36 = vpop.permute.xlu0 %513 }
 0x1fb   : > { %v547_v37 = vadd.f32 %v536_v35, %v498_v3  ;;  %v517_v40 = vsel %vm492_vm4, %v512_v27, %v514_v36 }
 0x1fc   : > { %v523_v56 = vadd.f32 %v517_v40, %v2373_v62 }
 0x1fe   : > { %v980_v33 = vpop.permute.xlu1 %979  ;;  %v538_v41 = vpop.permute.xlu0 %537 }
 0x1ff   : > { %v982_v45 = vsel %vm443_vm3, %v978_v14, %v980_v33  ;;  %v542_v42 = vsel %vm541_vm5, %v536_v35, %v538_v41 }
 0x200   : > { %v988_v43 = vadd.f32 %v982_v45, %v948_v8  ;;  %v548_v61 = vadd.f32 %v542_v42, %v499_v9 }
 0x202   : > { %v1016_v24 = vpop.permute.xlu1 %1015  ;;  %v1000_v18 = vpop.permute.xlu0 %999 }
 0x203   : > { %v1026_v46 = vadd.f32 %v1016_v24, %v986_v12  ;;  %v1002_v55 = vsel %vm492_vm4, %v998_v25, %v1000_v18 }
 0x204   : > { %v1008_v29 = vadd.f32 %v1002_v55, %v968_v52 }
 0x206   : > { %v1036_v49 = vpop.permute.xlu1 %1035  ;;  %v1018_v50 = vpop.permute.xlu0 %1017 }
 0x207   : > { %v1046_v23 = vadd.f32 %v1036_v49, %v1006_v17  ;;  %v1021_v62 = vsel %vm492_vm4, %v1016_v24, %v1018_v50 }
 0x208   : > { %v1027_v51 = vadd.f32 %v1021_v62, %v987_v20 }
 0x20a   : > { %v516_v53 = vpop.permute.xlu1 %515  ;;  %v1038_v57 = vpop.permute.xlu0 %1037 }
 0x20b   : > { %v518_v58 = vsel %vm492_vm4, %v514_v36, %v516_v53  ;;  %v1041_v59 = vsel %vm541_vm5, %v1036_v49, %v1038_v57 }
 0x20c   : > { %v524_v60 = vadd.f32 %v518_v58, %v475_v38  ;;  %v1047_v63 = vadd.f32 %v1041_v59, %v1007_v19 }
 0x20e   : > { %v561_v0 = vpop.permute.xlu1 %560  ;;  %v540_v1 = vpop.permute.xlu0 %539 }
 0x20f   : > { %v571_v39 = vadd.f32 %v561_v0, %v522_v30  ;;  %v543_v2 = vsel %vm541_vm5, %v538_v41, %v540_v1 }
 0x210   : > { %v549_v3 = vadd.f32 %v543_v2, %v500_v34 }
 0x212   : > { %v585_v22 = vpop.permute.xlu1 %584  ;;  %v563_v4 = vpop.permute.xlu0 %562 }
 0x213   : > { %v596_v5 = vadd.f32 %v585_v22, %v547_v37  ;;  %v566_v6 = vsel %vm541_vm5, %v561_v0, %v563_v4 }
 0x214   : > { %v572_v15 = vadd.f32 %v566_v6, %v523_v56 }
 0x216   : > { %v1020_v16 = vpop.permute.xlu1 %1019  ;;  %v587_v7 = vpop.permute.xlu0 %586 }
 0x217   : > { %v1022_v44 = vsel %vm492_vm4, %v1018_v50, %v1020_v16  ;;  %v591_v30 = vsel %vm590_vm6, %v585_v22, %v587_v7 }
 0x218   : > { %v1028_v8 = vadd.f32 %v1022_v44, %v988_v43  ;;  %v597_v40 = vadd.f32 %v591_v30, %v548_v61 }
 0x21a   : > { %v1056_v9 = vpop.permute.xlu1 %1055  ;;  %v1040_v10 = vpop.permute.xlu0 %1039 }
 0x21b   : > { %v1042_v48 = vsel %vm541_vm5, %v1038_v57, %v1040_v10  ;;  %v1066_v56 = vadd.f32 %v1056_v9, %v1026_v46 }
 0x21c   : > { %v1048_v11 = vadd.f32 %v1042_v48, %v1008_v29 }
 0x21e   : > { %v1076_v12 = vpop.permute.xlu1 %1075  ;;  %v1058_v13 = vpop.permute.xlu0 %1057 }
 0x21f   : > { %v1061_v31 = vsel %vm541_vm5, %v1056_v9, %v1058_v13  ;;  %v1086_v45 = vadd.f32 %v1076_v12, %v1046_v23 }
 0x220   : > { %v1067_v42 = vadd.f32 %v1061_v31, %v1027_v51 }
 0x222   : > { %v565_v52 = vpop.permute.xlu1 %564  ;;  %v1078_v32 = vpop.permute.xlu0 %1077 }
 0x223   : > { %v567_v34 = vsel %vm541_vm5, %v563_v4, %v565_v52  ;;  %v1081_v35 = vsel %vm590_vm6, %v1076_v12, %v1078_v32 }
 0x224   : > { %v573_v43 = vadd.f32 %v567_v34, %v524_v60  ;;  %v1087_v18 = vadd.f32 %v1081_v35, %v1047_v63 }
 0x226   : > { %v610_v14 = vpop.permute.xlu1 %609  ;;  %v589_v17 = vpop.permute.xlu0 %588 }
 0x227   : > { %v592_v33 = vsel %vm590_vm6, %v587_v7, %v589_v17  ;;  %v620_v50 = vadd.f32 %v610_v14, %v571_v39 }
 0x228   : > { %v598_v62 = vadd.f32 %v592_v33, %v549_v3 }
 0x22a   : > { %v634_v54 = vpop.permute.xlu1 %633  ;;  %v612_v20 = vpop.permute.xlu0 %611 }
 0x22b   : > { %v615_v41 = vsel %vm590_vm6, %v610_v14, %v612_v20  ;;  %v645_v55 = vadd.f32 %v634_v54, %v596_v5 }
 0x22c   : > { %v621_v53 = vadd.f32 %v615_v41, %v572_v15 }
 0x22e   : > { %v1060_v21 = vpop.permute.xlu1 %1059  ;;  %v636_v25 = vpop.permute.xlu0 %635 }
 0x22f   : > { %v1062_v24 = vsel %vm541_vm5, %v1058_v13, %v1060_v21  ;;  %v640_v29 = vsel %vm639_vm7, %v634_v54, %v636_v25 }
 0x230   : > { %v1068_v58 = vadd.f32 %v1062_v24, %v1028_v8  ;;  %v646_v60 = vadd.f32 %v640_v29, %v597_v40 }
 0x232   : > { %v1096_v26 = vpop.permute.xlu1 %1095  ;;  %v1080_v47 = vpop.permute.xlu0 %1079 }
 0x233   : > { %v1082_v49 = vsel %vm590_vm6, %v1078_v32, %v1080_v47  ;;  %v1106_v63 = vadd.f32 %v1096_v26, %v1066_v56 }
 0x234   : > { %v1088_v0 = vadd.f32 %v1082_v49, %v1048_v11 }
 0x236   : > { %v1116_v38 = vpop.permute.xlu1 %1115  ;;  %v1098_v19 = vpop.permute.xlu0 %1097 }
 0x237   : > { %v1101_v23 = vsel %vm590_vm6, %v1096_v26, %v1098_v19  ;;  %v1126_v39 = vadd.f32 %v1116_v38, %v1086_v45 }
 0x238   : > { %v2492_v4 = vadd.f32 %v1101_v23, %v1067_v42 }
 0x23a   : > { %v614_v27 = vpop.permute.xlu1 %613  ;;  %v2473_v28 = vpop.permute.xlu0 %1117 }
 0x23b   : > { %v616_v51 = vsel %vm590_vm6, %v612_v20, %v614_v27  ;;  %v1121_v1 = vsel %vm639_vm7, %v1116_v38, %v2473_v28 }
 0x23c   : > { %v2494_v5 = vadd.f32 %v616_v51, %v573_v43  ;;  %v2498_v44 = vadd.f32 %v1121_v1, %v1087_v18 }
 0x23e   : > { %v659_v36 = vpop.permute.xlu1 %658  ;;  %v638_v37 = vpop.permute.xlu0 %637 }
 0x23f   : > { %v641_v61 = vsel %vm639_vm7, %v636_v25, %v638_v37  ;;  %v2503_v52 = vadd.f32 %v659_v36, %v620_v50 }
 0x240   : > { %v647_v2 = vadd.f32 %v641_v61, %v598_v62 }
 0x242   : > { %v681_v46 = vpop.permute.xlu1 %680  ;;  %v2485_v57 = vpop.permute.xlu0 %660 }
 0x243   : > { %v689_v59 = vadd.f32 %v681_v46, %v645_v55  ;;  %v664_v15 = vsel %vm639_vm7, %v659_v36, %v2485_v57 }
 0x244   : > { %v2505_v32 = vadd.f32 %v664_v15, %v621_v53 }
 0x245   : > { %v712_v3 = vsel %vm711_vm8, %v689_v59, 0.0  ;;  %v737_v22 = vrot.slane %v689_v59, 4 }
 0x246   : > { %v713_v6 = vrot.slane %v712_v3, 4  ;;  %v1100_v16 = vpop.permute.xlu1 %1099  ;;  %v683_v7 = vpop.permute.xlu0 %682 }
 0x247   : > { %v743_v8 = vsel %vm711_vm8, %v737_v22, 0.0  ;;  %v685_v9 = vsel %vm684_vm9, %v681_v46, %v683_v7  ;;  %v691_v10 = vadd.f32 %v683_v7, %v647_v2  ;;  %v1102_v12 = vsel %vm590_vm6, %v1098_v19, %v1100_v16 }
 0x248   : > { %v714_v48 = vadd.f32 %v713_v6, %v712_v3  ;;  %v744_v11 = vrot.slane %v743_v8, 4  ;;  %v690_v13 = vadd.f32 %v685_v9, %v646_v60  ;;  %v2509_v38 = vadd.f32 %v1102_v12, %v1068_v58 }
 0x249   : > { %v727_v14 = vsel %vm726_vm10, %v691_v10, 0.0  ;;  %v739_v17 = vrot.slane %v691_v10, 4 }
 0x24a   : > { %v715_v54 = vrot.slane %v714_v48, 2  ;;  %v745_v20 = vadd.f32 %v744_v11, %v743_v8  ;;  %v719_v21 = vsel %vm303_vm0, %v690_v13, 0.0  ;;  %v728_v25 = vrot.slane %v727_v14, 4  ;;  %v1136_v26 = vpop.permute.xlu1 %1135  ;;  %v1120_v47 = vpop.permute.xlu0 %1119 }
 0x24b   : > { %v720_v27 = vrot.slane %v719_v21, 4  ;;  %v738_v30 = vrot.slane %v690_v13, 4  ;;  %v757_v19 = vsel %vm726_vm10, %v739_v17, 0.0  ;;  %v2513_v56 = vadd.f32 %v1136_v26, %v1106_v63 }
 0x24c   : > { %v716_v31 = vadd.f32 %v715_v54, %v714_v48  ;;  %v746_v34 = vrot.slane %v745_v20, 2  ;;  %v729_v35 = vadd.f32 %v728_v25, %v727_v14  ;;  %v758_v36 = vrot.slane %v757_v19, 4 }
 0x24d   : > { %v721_v37 = vadd.f32 %v720_v27, %v719_v21  ;;  %v750_v40 = vsel %vm303_vm0, %v738_v30, 0.0  ;;  %v1122_v33 = vsel %vm639_vm7, %v2473_v28, %v1120_v47 }
 0x24e   : > { %v717_v41 = vrot.slane %v716_v31, 1  ;;  %v747_v45 = vadd.f32 %v746_v34, %v745_v20  ;;  %v730_v42 = vrot.slane %v729_v35, 2  ;;  %v751_v43 = vrot.slane %v750_v40, 4  ;;  %v1154_v24 = vpop.permute.xlu1 %1153  ;;  %v2517_v18 = vpop.permute.xlu0 %1137 }
 0x24f   : > { %v722_v55 = vrot.slane %v721_v37, 2  ;;  %v759_v29 = vadd.f32 %v758_v36, %v757_v19  ;;  %v1128_v49 = vadd.f32 %v1122_v33, %v1088_v0  ;;  %v1161_v50 = vadd.f32 %v1154_v24, %v1126_v39 }
 0x250   : > { %v2519_v62 = vadd.f32 %v717_v41, %v716_v31  ;;  %v748_v53 = vrot.slane %v747_v45, 1  ;;  %v731_v61 = vadd.f32 %v730_v42, %v729_v35  ;;  %v752_v46 = vadd.f32 %v751_v43, %v750_v40 }
 0x251   : > { %v723_v58 = vadd.f32 %v722_v55, %v721_v37  ;;  %v760_v23 = vrot.slane %v759_v29, 2  ;;  %v1179_v28 = vsel %vm711_vm8, %v1161_v50, 0.0  ;;  %v1203_v51 = vrot.slane %v1161_v50, 4 }
 0x252   : > { %v2522_v59 = vadd.f32 %v748_v53, %v747_v45  ;;  %v732_v60 = vrot.slane %v731_v61, 1  ;;  %v753_v63 = vrot.slane %v752_v46, 2  ;;  %v1180_v1 = vrot.slane %v1179_v28, 4  ;;  %v663_v2 = vpop.permute.xlu1 %662  ;;  %v1156_v3 = vpop.permute.xlu0 %1155 }
 0x253   : > { %v724_v22 = vrot.slane %v723_v58, 1  ;;  %v761_v0 = vadd.f32 %v760_v23, %v759_v29  ;;  %v1209_v39 = vsel %vm711_vm8, %v1203_v51, 0.0  ;;  %v1141_v6 = vsel %vm639_vm7, %v1136_v26, %v2517_v18 }
 0x254   : > { %v2527_v15 = vadd.f32 %v732_v60, %v731_v61  ;;  %v754_v16 = vadd.f32 %v753_v63, %v752_v46  ;;  %v1181_v7 = vadd.f32 %v1180_v1, %v1179_v28  ;;  %v1210_v8 = vrot.slane %v1209_v39, 4 }
 0x255   : > { %v2529_v9 = vadd.f32 %v724_v22, %v723_v58  ;;  %v762_v10 = vrot.slane %v761_v0, 1  ;;  %v2532_v48 = vadd.f32 %v1141_v6, %v2492_v4  ;;  %v665_v11 = vsel %vm639_vm7, %v2485_v57, %v663_v2 }
 0x256   : > { %v755_v12 = vrot.slane %v754_v16, 1  ;;  %v1182_v13 = vrot.slane %v1181_v7, 2  ;;  %v1211_v14 = vadd.f32 %v1210_v8, %v1209_v39  ;;  %v671_v17 = vadd.f32 %v665_v11, %v2494_v5  ;;  %v703_v54 = vpop.permute.xlu1 %702  ;;  %v701_v20 = vpop.permute.xlu0 %700 }
 0x257   : > { %v2537_v21 = vadd.f32 %v762_v10, %v761_v0  ;;  %v1157_v25 = vsel %vm684_vm9, %v1154_v24, %v1156_v3  ;;  %v1163_v26 = vadd.f32 %v1156_v3, %v1128_v49  ;;  %v704_v47 = vsel %vm684_vm9, %v701_v20, %v703_v54 }
 0x258   : > { %v2541_v27 = vadd.f32 %v755_v12, %v754_v16  ;;  %v1183_v4 = vadd.f32 %v1182_v13, %v1181_v7  ;;  %v1212_v30 = vrot.slane %v1211_v14, 2  ;;  %v1162_v57 = vadd.f32 %v1157_v25, %v2498_v44 }
 0x259   : > { %v1193_v19 = vsel %vm726_vm10, %v1163_v26, 0.0  ;;  %v1205_v31 = vrot.slane %v1163_v26, 4  ;;  %v710_v34 = vadd.f32 %v703_v54, %v671_v17  ;;  %v708_v5 = vadd.f32 %v701_v20, %v2503_v52 }
 0x25a   : > { %v1184_v35 = vrot.slane %v1183_v4, 1  ;;  %v1213_v36 = vadd.f32 %v1212_v30, %v1211_v14  ;;  %v1186_v37 = vsel %vm303_vm0, %v1162_v57, 0.0  ;;  %v1194_v40 = vrot.slane %v1193_v19, 4  ;;  %v1140_v17 = vpop.permute.xlu0 %1139 }
 0x25b   : > { %v1187_v33 = vrot.slane %v1186_v37, 4  ;;  %v1204_v41 = vrot.slane %v1162_v57, 4  ;;  %v1223_v45 = vsel %vm726_vm10, %v1205_v31, 0.0  ;;  %v778_v42 = vsel %vm726_vm10, %v710_v34, 0.0  ;;  %v1169_v57 = vpop.permute.xlu1 %1168 }
 0x25c   : > { %v2549_v43 = vadd.f32 %v1184_v35, %v1183_v4  ;;  %v1214_v44 = vrot.slane %v1213_v36, 1  ;;  %v1195_v24 = vadd.f32 %v1194_v40, %v1193_v19  ;;  %v1224_v55 = vrot.slane %v1223_v45, 4 }
 0x25d   : > { %v1188_v29 = vadd.f32 %v1187_v33, %v1186_v37  ;;  %v1216_v49 = vsel %vm303_vm0, %v1204_v41, 0.0  ;;  %v779_v52 = vrot.slane %v778_v42, 4  ;;  %v790_v50 = vrot.slane %v710_v34, 4 }
 0x25e   : > { %v2552_v53 = vadd.f32 %v1214_v44, %v1213_v36  ;;  %v1196_v61 = vrot.slane %v1195_v24, 2  ;;  %v1217_v46 = vrot.slane %v1216_v49, 4  ;;  %v1225_v58 = vadd.f32 %v1224_v55, %v1223_v45 }
 0x25f   : > { %v1189_v23 = vrot.slane %v1188_v29, 2  ;;  %v780_v28 = vadd.f32 %v779_v52, %v778_v42  ;;  %v808_v51 = vsel %vm726_vm10, %v790_v50, 0.0  ;;  %v709_v60 = vadd.f32 %v704_v47, %v2505_v32 }
 0x260   : > { %v1197_v63 = vadd.f32 %v1196_v61, %v1195_v24  ;;  %v1218_v1 = vadd.f32 %v1217_v46, %v1216_v49  ;;  %v1226_v2 = vrot.slane %v1225_v58, 2  ;;  %v809_v3 = vrot.slane %v808_v51, 4 }
 0x261   : > { %v1190_v22 = vadd.f32 %v1189_v23, %v1188_v29  ;;  %v781_v0 = vrot.slane %v780_v28, 2  ;;  %v764_v39 = vsel %vm711_vm8, %v708_v5, 0.0  ;;  %v771_v6 = vsel %vm303_vm0, %v709_v60, 0.0 }
 0x262   : > { %v1198_v16 = vrot.slane %v1197_v63, 1  ;;  %v1219_v7 = vrot.slane %v1218_v1, 2  ;;  %v1227_v8 = vadd.f32 %v1226_v2, %v1225_v58  ;;  %v810_v10 = vadd.f32 %v809_v3, %v808_v51 }
 0x263   : > { %v1191_v11 = vrot.slane %v1190_v22, 1  ;;  %v782_v12 = vadd.f32 %v781_v0, %v780_v28  ;;  %v765_v13 = vrot.slane %v764_v39, 4  ;;  %v772_v14 = vrot.slane %v771_v6, 4 }
 0x264   : > { %v2558_v32 = vadd.f32 %v1198_v16, %v1197_v63  ;;  %v1220_v54 = vadd.f32 %v1219_v7, %v1218_v1  ;;  %v1228_v20 = vrot.slane %v1227_v8, 1  ;;  %v811_v25 = vrot.slane %v810_v10, 2 }
 0x265   : > { %v2560_v26 = vadd.f32 %v1191_v11, %v1190_v22  ;;  %v783_v47 = vrot.slane %v782_v12, 1  ;;  %v766_v4 = vadd.f32 %v765_v13, %v764_v39  ;;  %v773_v30 = vadd.f32 %v772_v14, %v771_v6 }
 0x266   : > { %v1221_v19 = vrot.slane %v1220_v54, 1  ;;  %v2562_v31 = vadd.f32 %v1228_v20, %v1227_v8  ;;  %v2564_v34 = vadd.f32 %v811_v25, %v810_v10  ;;  %v788_v35 = vrot.slane %v708_v5, 4  ;;  %v1171_v5 = vpop.permute.xlu0 %1170 }
 0x267   : > { %v2566_v36 = vadd.f32 %v783_v47, %v782_v12  ;;  %v767_v37 = vrot.slane %v766_v4, 2  ;;  %v774_v40 = vrot.slane %v773_v30, 2  ;;  %v789_v33 = vrot.slane %v709_v60, 4 }
 0x268   : > { %v2568_v41 = vadd.f32 %v1221_v19, %v1220_v54  ;;  %v794_v45 = vsel %vm711_vm8, %v788_v35, 0.0  ;;  %v1176_v42 = vadd.f32 %v1169_v57, %v2513_v56  ;;  %v1142_v44 = vsel %vm639_vm7, %v2517_v18, %v1140_v17 }
 0x269   : > { %v768_v24 = vadd.f32 %v767_v37, %v766_v4  ;;  %v775_v55 = vadd.f32 %v774_v40, %v773_v30  ;;  %v795_v29 = vrot.slane %v794_v45, 4  ;;  %v801_v49 = vsel %vm303_vm0, %v789_v33, 0.0 }
 0x26a   : > { %v802_v52 = vrot.slane %v801_v49, 4  ;;  %v1230_v50 = vsel %vm711_vm8, %v1176_v42, 0.0  ;;  %v1254_v61 = vrot.slane %v1176_v42, 4  ;;  %v1148_v46 = vadd.f32 %v1142_v44, %v2509_v38 }
 0x26b   : > { %v769_v58 = vrot.slane %v768_v24, 1  ;;  %v776_v23 = vrot.slane %v775_v55, 1  ;;  %v796_v28 = vadd.f32 %v795_v29, %v794_v45  ;;  %v1231_v51 = vrot.slane %v1230_v50, 4 }
 0x26c   : > { %v803_v56 = vadd.f32 %v802_v52, %v801_v49  ;;  %v1260_v60 = vsel %vm711_vm8, %v1254_v61, 0.0  ;;  %v1172_v18 = vsel %vm684_vm9, %v1169_v57, %v1171_v5  ;;  %v1178_v63 = vadd.f32 %v1171_v5, %v1148_v46 }
 0x26d   : > { %v770_v1 = vadd.f32 %v769_v58, %v768_v24  ;;  %v777_v2 = vadd.f32 %v776_v23, %v775_v55  ;;  %v797_v3 = vrot.slane %v796_v28, 2  ;;  %v1232_v22 = vadd.f32 %v1231_v51, %v1230_v50 }
 0x26e   : > { %v804_v0 = vrot.slane %v803_v56, 2  ;;  %v1261_v39 = vrot.slane %v1260_v60, 4  ;;  %v1177_v38 = vadd.f32 %v1172_v18, %v2532_v48  ;;  %v1244_v6 = vsel %vm726_vm10, %v1178_v63, 0.0 }
 0x26f   : > { %v798_v16 = vadd.f32 %v797_v3, %v796_v28  ;;  %v1233_v7 = vrot.slane %v1232_v22, 2  ;;  %v1245_v8 = vrot.slane %v1244_v6, 4  ;;  %v1256_v10 = vrot.slane %v1178_v63, 4 }
 0x270   : > { %v805_v11 = vadd.f32 %v804_v0, %v803_v56  ;;  %v1262_v12 = vadd.f32 %v1261_v39, %v1260_v60  ;;  %v1237_v13 = vsel %vm303_vm0, %v1177_v38, 0.0  ;;  %v1255_v14 = vrot.slane %v1177_v38, 4 }
 0x271   : > { %v799_v17 = vrot.slane %v798_v16, 1  ;;  %v1234_v54 = vadd.f32 %v1233_v7, %v1232_v22  ;;  %v1238_v20 = vrot.slane %v1237_v13, 4  ;;  %v1246_v25 = vadd.f32 %v1245_v8, %v1244_v6 }
 0x272   : > { %v806_v47 = vrot.slane %v805_v11, 1  ;;  %v1263_v4 = vrot.slane %v1262_v12, 2  ;;  %v1267_v48 = vsel %vm303_vm0, %v1255_v14, 0.0  ;;  %v1274_v30 = vsel %vm726_vm10, %v1256_v10, 0.0 }
 0x273   : > { %v800_v57 = vadd.f32 %v799_v17, %v798_v16  ;;  %v1235_v19 = vrot.slane %v1234_v54, 1  ;;  %v1239_v35 = vadd.f32 %v1238_v20, %v1237_v13  ;;  %v1247_v37 = vrot.slane %v1246_v25, 2 }
 0x274   : > { %v807_v40 = vadd.f32 %v806_v47, %v805_v11  ;;  %v1264_v33 = vadd.f32 %v1263_v4, %v1262_v12  ;;  %v1268_v45 = vrot.slane %v1267_v48, 4  ;;  %v1275_v42 = vrot.slane %v1274_v30, 4 }
 0x275   : > { %v1236_v44 = vadd.f32 %v1235_v19, %v1234_v54  ;;  %v1240_v24 = vrot.slane %v1239_v35, 2  ;;  %v1248_v55 = vadd.f32 %v1247_v37, %v1246_v25  ;;  %v813_v29 = vrot.slane %v2564_v34, 1 }
 0x276   : > { %v1265_v49 = vrot.slane %v1264_v33, 1  ;;  %v1269_v5 = vadd.f32 %v1268_v45, %v1267_v48  ;;  %v1276_v52 = vadd.f32 %v1275_v42, %v1274_v30  ;;  %v818_v50 = vsel %vm815_vm12, %v2527_v15, %v2537_v21 }
 0x277   : > { %v1241_v61 = vadd.f32 %v1240_v24, %v1239_v35  ;;  %v1249_v46 = vrot.slane %v1248_v55, 1  ;;  %v814_v58 = vadd.f32 %v813_v29, %v2564_v34  ;;  %v822_v23 = vsel %vm819_vm11, %v818_v50, %v2566_v36 }
 0x278   : > { %v1266_v28 = vadd.f32 %v1265_v49, %v1264_v33  ;;  %v1270_v51 = vrot.slane %v1269_v5, 2  ;;  %v1277_v56 = vrot.slane %v1276_v52, 2  ;;  %v816_v60 = vsel %vm815_vm12, %v2519_v62, %v2522_v59 }
 0x279   : > { %v1242_v18 = vrot.slane %v1241_v61, 1  ;;  %v1250_v63 = vadd.f32 %v1249_v46, %v1248_v55  ;;  %v826_v3 = vsel %vm823_vm13, %v822_v23, %v814_v58  ;;  %v817_v15 = vsel %vm815_vm12, %v2529_v9, %v2541_v27 }
 0x27a   : > { %v1271_v21 = vadd.f32 %v1270_v51, %v1269_v5  ;;  %v1278_v34 = vadd.f32 %v1277_v56, %v1276_v52  ;;  %833 = vrot.lane.b32.xlu0 %v826_v3, %s1825_s26  ;;  %v820_v36 = vsel %vm819_vm11, %v816_v60, %v770_v1  ;;  %v821_v22 = vsel %vm819_vm11, %v817_v15, %v777_v2 }
 0x27b   : > { %v1243_v0 = vadd.f32 %v1242_v18, %v1241_v61  ;;  %v824_v39 = vsel %vm823_vm13, %v820_v36, %v800_v57  ;;  %v825_v62 = vsel %vm823_vm13, %v821_v22, %v807_v40  ;;  %v1283_v59 = vsel %vm815_vm12, %v2558_v32, %v2562_v31 }
 0x27c   : > { %v1272_v38 = vrot.slane %v1271_v21, 1  ;;  %v830_v6 = vcombine.low %v824_v39, %v825_v62  ;;  %v1279_v9 = vrot.slane %v1278_v34, 1  ;;  %v1286_v27 = vsel %vm819_vm11, %v1283_v59, %v1250_v63 }
 0x27d   : > { %v1281_v1 = vsel %vm815_vm12, %v2549_v43, %v2552_v53  ;;  %v1282_v2 = vsel %vm815_vm12, %v2560_v26, %v2568_v41 }
 0x27e   : > { %v1273_v16 = vadd.f32 %v1272_v38, %v1271_v21  ;;  %831 = vrot.lane.b32.xlu1 %v830_v6, %s1825_s26  ;;  %v1280_v7 = vadd.f32 %v1279_v9, %v1278_v34  ;;  %v1284_v8 = vsel %vm819_vm11, %v1281_v1, %v1236_v44  ;;  %v1285_v32 = vsel %vm819_vm11, %v1282_v2, %v1243_v0 }
 0x27f   : > { %v1287_v31 = vsel %vm823_vm13, %v1284_v8, %v1266_v28 }
 0x280   : > { %v1289_v10 = vsel %vm823_vm13, %v1286_v27, %v1280_v7  ;;  %v1288_v11 = vsel %vm823_vm13, %v1285_v32, %v1273_v16 }
 0x281   : > { %1296 = vrot.lane.b32.xlu0 %v1289_v10, %s1825_s26  ;;  %v1293_v43 = vcombine.low %v1287_v31, %v1288_v11 }
 0x283   : > { %1294 = vrot.lane.b32.xlu1 %v1293_v43, %s1825_s26 }
 0x2ec   : > { %v834_v53 = vpop.permute.xlu0 %833 }
 0x2ed   : > { %v836_v41 = vrot.slane %v834_v53, 4 }
 0x2f0   : > { %v832_v26 = vpop.permute.xlu1 %831 }
 0x2f1   : > { %v835_v12 = vrot.slane %v832_v26, 4 }
 0x2f3   : > { %v837_v13 = vsel %vm303_vm0, %v835_v12, %v836_v41  ;;  %v1297_v14 = vpop.permute.xlu0 %1296 }
 0x2f4   : > { %v839_v17 = vsel %vm838_vm14, %v832_v26, %v837_v13  ;;  %v1299_v20 = vrot.slane %v1297_v14, 4 }
 0x2f5   : > { %841 = vst [vmem:[%s282_s11] sm:$0xff] %v839_v17  ;;  %v1295_v54 = vpop.permute.xlu1 %1294 }
 0x2f6   : > { %v1298_v25 = vrot.slane %v1295_v54, 4 }
 0x2f8   : > { %v1300_v47 = vsel %vm303_vm0, %v1298_v25, %v1299_v20 }
 0x2f9   : > { %v1301_v4 = vsel %vm838_vm14, %v1295_v54, %v1300_v47 }
 0x2fa   : > { %1303 = vst [vmem:[%s282_s11 + $0x8] sm:$0xff] %v1301_v4 }
 0x2fb   : > { %1713 = shalt.err (!%p1710_p8)
}
 0x2fc   : > { %s1714_s28 = scalar_lea.hbm %s2624_s25, 256  ;;  %s1718_s8 = scalar_lea.hbm %s2682_s4, 512 }
 0x2fd   : > { %p1715_p12 = scmp.ne.s32.totalorder %s2624_s25, %s1714_s28  ;;  %p1719_p10 = scmp.lt.u32.totalorder %s2624_s25, %s2682_s4 }
 0x2fe   : > { %p1720_p0 = scmp.lt.u32.totalorder %s1718_s8, %s1714_s28  ;;  %p1722_p11 = scmp.lt.u32.totalorder %s1714_s28, %s2624_s25 }
 0x2ff   : > { %p1716_p13 = pnand %p1715_p12, %p2716_p9 }
 0x300   : > { %p1721_p6 = por %p1720_p0, %p1719_p10 }
 0x301   : > { %p1717_p7 = pneg %p1716_p13 }
 0x302   : > { %p1723_p5 = por %p1722_p11, %p1721_p6 }
 0x304   : > { %p1724_p2 = pnand %p1723_p5, %p1717_p7 }
 0x306   : > { %1727 = shalt.err (!%p1724_p2)
}
 0x307   : > { %1475 = dma.vmem_to_hbm [thread:$0]  (%p2716_p9), %s2626_s9, 256, %s2624_s25, %s1305_s14  }
 0x308 PF: > { %s1331_s7 = sand.u32 1, %s1790_s18   ;;  %p2717_p4 = scmp.ne.s32.totalorder %s2702_s13, 0 }
 0x309   : > { %p2718_p1 = scmp.ge.s32.totalorder %s1802_s21, 2  ;;  %s1332_s26 = scalar_lea.sflag [#allocation4], %s1331_s7 }
 0x30b   : > { %p1485_p3 = pnand %p2718_p1, %p2717_p4 }
 0x30d   : > { %1773 = dma.done.wait (!%p1485_p3), %s1332_s26, 256  }
 0x30e   : > { %1775 = vsyncadd (!%p1485_p3), %s1332_s26, 4294967040  ;;  %s2719_s21 = sld [smem:[#allocation15_spill]]  ;;  %s2720_s11 = sld [smem:[#allocation17_spill]] }
 0x30f   : > { %s2721_s12 = sld [smem:[#allocation16_spill]]  ;;  %s2722_s15 = smov %s1782_s16 }
 0x310   : > { %s2723_s16 = smov %s1786_s17  ;;  %s2725_s18 = smov %s1794_s19 }
 0x311   : > { %s2726_s19 = smov %s1798_s20 }
 0x314   : > { %p16_p9 = scmp.ge.s32.totalorder %s2719_s21, 4   ;;  %s2724_s17 = smov %s2720_s11 }
 0x315   : > { %s2727_s20 = smov %s2721_s12 }
 0x316   :  { %18 = sbr.rel (!%p16_p9) target bundleno = 9 (0x9), region = 99 }
 0x31d   :  { %1337 = vsyncpa [#allocation3], 1 }
 0x31e   :  { %1339 = vsyncpa [#allocation3 + $0x1], 1 }
 0x31f   :  { %1340 = vsyncpa [#allocation6], 1 }
 0x320   :  { %1341 = vsyncpa [#allocation4], 1 }
 0x321   :  { %1343 = vsyncpa [#allocation4 + $0x1], 1 }

</bundles_post_ra>
